<compile_context>
chip_gen: v6e
topology: v6e:2x2x1
jax: 0.10.0
libtpu: 0.0.40
codegen_flags: <defaults>
</compile_context>

<pallas_src>
import math
import functools

import jax
import jax.numpy as jnp
from jax import lax
from jax.experimental import pallas as pl
from jax.experimental.pallas import tpu as pltpu

# Scoped-VMEM budget. Conservative so it also holds on v7x (64 MiB physical
# per TensorCore). TODO(synk): make generation-aware (raise to 64-96 MiB on
# v6e, cap ~48 MiB on v7x, 128-wide tiles + deeper K/V buffering on v5e).
_VMEM_LIMIT = 32 * 1024 * 1024

# Finite "-inf". Must be a plain Python float (NOT a jnp scalar) so the kernel
# bodies do not capture a traced constant.
_NEG_BIG = -1e30


def _pick_tile(n):
    """Largest MXU/lane-friendly tile that divides n (falls back to full n).
    TODO(synk): prefer 128 on v5e (4x128 MXU, lowest HBM bandwidth)."""
    for c in (256, 128):
        if n % c == 0:
            return c
    return n


# ---------------------------------------------------------------------------
# Kernel 1: fused QKV projection  (x @ [Wq*scale | Wk | Wv] + bias),
# emitting q/k/v directly in head-major (B, NH, S, hd) bf16 layout.
# ---------------------------------------------------------------------------
def _qkv_proj_kernel(x_ref, w_ref, b_ref, q_ref, k_ref, v_ref, *,
                     num_heads, head_dim):
    x = x_ref[0]                                            # (ts, E) bf16
    acc = jnp.dot(x, w_ref[...], preferred_element_type=jnp.float32)
    acc = acc + b_ref[...]                                  # (ts, 3H) f32
    ts = acc.shape[0]
    H = num_heads * head_dim

    def head_major(t):                                      # (ts,H)->(NH,ts,hd)
        return t.reshape(ts, num_heads, head_dim).swapaxes(0, 1)

    q_ref[0] = head_major(acc[:, :H]).astype(q_ref.dtype)
    k_ref[0] = head_major(acc[:, H:2 * H]).astype(k_ref.dtype)
    v_ref[0] = head_major(acc[:, 2 * H:]).astype(v_ref.dtype)


# ---------------------------------------------------------------------------
# Kernel 2: causal flash attention (online softmax, head-batched matmuls).
# Outputs ctx in (B, S, H) bf16 (lane-dense) and per-row logsumexp (f32),
# which the aux attention-weights kernel reuses for normalization.
# ---------------------------------------------------------------------------
def _flash_attn_kernel(q_ref, k_ref, v_ref, o_ref, lse_ref,
                       m_sc, l_sc, acc_sc, *, tq, tk):
    qi = pl.program_id(1)
    ki = pl.program_id(2)

    @pl.when(ki == 0)
    def _init():
        m_sc[...] = jnp.full_like(m_sc, _NEG_BIG)
        l_sc[...] = jnp.zeros_like(l_sc)
        acc_sc[...] = jnp.zeros_like(acc_sc)

    # kv tiles strictly above the diagonal contribute nothing -> skipped
    # (and their DMAs are elided via the clamped k/v index_map).
    @pl.when(ki <= qi)
    def _compute():
        q = q_ref[0]                                        # (NH,tq,hd) bf16, pre-scaled
        k = k_ref[0]                                        # (NH,tk,hd) bf16
        v = v_ref[0]                                        # (NH,tk,hd) bf16
        s = jnp.einsum("hqd,hkd->hqk", q, k,
                       preferred_element_type=jnp.float32)  # (NH,tq,tk)

        def online_update(s_val):
            m_prev = m_sc[...]
            m_new = jnp.maximum(m_prev, jnp.max(s_val, axis=-1, keepdims=True))
            alpha = jnp.exp(m_prev - m_new)
            p = jnp.exp(s_val - m_new)
            l_sc[...] = alpha * l_sc[...] + jnp.sum(p, axis=-1, keepdims=True)
            acc_sc[...] = alpha * acc_sc[...] + jnp.einsum(
                "hqk,hkd->hqd", p.astype(v.dtype), v,
                preferred_element_type=jnp.float32)
            m_sc[...] = m_new

        # Unmasked fast path below the diagonal; mask only the diagonal tile.
        @pl.when(ki < qi)
        def _off_diag():
            online_update(s)

        @pl.when(ki == qi)
        def _diag():
            q_pos = lax.broadcasted_iota(jnp.int32, (tq, tk), 0)
            k_pos = lax.broadcasted_iota(jnp.int32, (tq, tk), 1)
            online_update(jnp.where((k_pos > q_pos)[None], _NEG_BIG, s))

    # With tq == tk and ascending ki, the diagonal tile is the last
    # contributing kv tile for this q tile: normalize + store here.
    @pl.when(ki == qi)
    def _finalize():
        inv_l = pl.reciprocal(l_sc[...], approx=True)       # EUP, ~free
        ctx = acc_sc[...] * inv_l                           # (NH, tq, hd) f32
        nh, tq_, hd = ctx.shape
        # Lane-dense (tq, H) store; (B,S,H) layout needs no wrapper transpose.
        o_ref[0] = ctx.swapaxes(0, 1).reshape(tq_, nh * hd).astype(o_ref.dtype)
        lse_ref[0] = m_sc[...] + jnp.log(l_sc[...])


# ---------------------------------------------------------------------------
# Kernel 3: output projection  (ctx @ Wo + bo)
# ---------------------------------------------------------------------------
def _out_proj_kernel(c_ref, w_ref, b_ref, o_ref):
    acc = jnp.dot(c_ref[0], w_ref[...], preferred_element_type=jnp.float32)
    o_ref[0] = acc + b_ref[...]


# ---------------------------------------------------------------------------
# Kernel 4 (aux / decoupled from hot path): full attention-weights tensor,
# kv-tiled, normalized with the flash kernel's logsumexp, emitted in bf16.
# ---------------------------------------------------------------------------
def _attn_weights_kernel(q_ref, k_ref, lse_ref, attn_ref, *, tq, tk):
    qi = pl.program_id(1)
    ki = pl.program_id(2)

    @pl.when(ki > qi)
    def _zero():
        attn_ref[...] = jnp.zeros(attn_ref.shape, attn_ref.dtype)

    @pl.when(ki <= qi)
    def _compute():
        s = jnp.einsum("hqd,hkd->hqk", q_ref[0], k_ref[0],
                       preferred_element_type=jnp.float32)  # (NH,tq,tk)
        p = jnp.exp(s - lse_ref[0])                         # normalized probs

        @pl.when(ki < qi)
        def _off_diag():
            attn_ref[0] = p.astype(attn_ref.dtype)

        @pl.when(ki == qi)
        def _diag():
            q_pos = lax.broadcasted_iota(jnp.int32, (tq, tk), 0)
            k_pos = lax.broadcasted_iota(jnp.int32, (tq, tk), 1)
            attn_ref[0] = jnp.where((k_pos > q_pos)[None], 0.0,
                                    p).astype(attn_ref.dtype)


# ---------------------------------------------------------------------------
# Wrapper
# ---------------------------------------------------------------------------
def masked_mha(x, params, *, num_heads, return_attn=True):
    """x: [B, S, E] f32. Returns (out [B,S,E] f32, attn [B,nh,S,S] bf16|None)."""
    B, S, E = x.shape
    H = params["wq"].shape[1]
    hd = H // num_heads
    scale = 1.0 / math.sqrt(hd)

    ts = _pick_tile(S)        # seq tile for projection matmuls
    tq = tk = _pick_tile(S)   # flash attention tiles
    assert tq == tk, "diagonal-tile finalize assumes tq == tk"

    # bf16 matmul operands (cast once, outside the kernels); f32 biases.
    # The softmax scale is folded into Wq / bq here so no scalar enters kernels.
    x_bf = x.astype(jnp.bfloat16)
    w_qkv = jnp.concatenate(
        [params["wq"] * scale, params["wk"], params["wv"]],
        axis=1).astype(jnp.bfloat16)
    b_qkv = jnp.concatenate(
        [params["bq"] * scale, params["bk"], params["bv"]], axis=1)
    wo_bf = params["wo"].astype(jnp.bfloat16)

    proj_params = pltpu.CompilerParams(
        dimension_semantics=("parallel", "parallel"),
        vmem_limit_bytes=_VMEM_LIMIT)

    # ---- fused QKV projection (head-major bf16 outputs) ---------------------
    # TODO(synk): for large E/H, tile the E reduction and use pl.Buffered(1)
    # on the constant-index weight block so it is not double-buffered.
    qkv_kernel = functools.partial(_qkv_proj_kernel,
                                   num_heads=num_heads, head_dim=hd)
    qkv_out = jax.ShapeDtypeStruct((B, num_heads, S, hd), jnp.bfloat16)
    head_spec = pl.BlockSpec((1, num_heads, ts, hd), lambda b, s: (b, 0, s, 0))
    qh, kh, vh = pl.pallas_call(
        qkv_kernel,
        out_shape=(qkv_out, qkv_out, qkv_out),
        grid=(B, S // ts),
        in_specs=[
            pl.BlockSpec((1, ts, E), lambda b, s: (b, s, 0)),
            pl.BlockSpec((E, 3 * H), lambda b, s: (0, 0)),
            pl.BlockSpec((1, 3 * H), lambda b, s: (0, 0)),
        ],
        out_specs=(head_spec, head_spec, head_spec),
        compiler_params=proj_params,
    )(x_bf, w_qkv, b_qkv)

    # ---- flash attention -----------------------------------------------------
    flash_kernel = functools.partial(_flash_attn_kernel, tq=tq, tk=tk)
    ctx, lse = pl.pallas_call(
        flash_kernel,
        out_shape=(jax.ShapeDtypeStruct((B, S, H), jnp.bfloat16),
                   jax.ShapeDtypeStruct((B, num_heads, S, 1), jnp.float32)),
        grid=(B, S // tq, S // tk),
        in_specs=[
            pl.BlockSpec((1, num_heads, tq, hd),
                         lambda b, i, j: (b, 0, i, 0)),
            # Clamp kv index: skipped upper-triangular steps reuse the previous
            # block -> no new DMA for dead grid points.
            pl.BlockSpec((1, num_heads, tk, hd),
                         lambda b, i, j: (b, 0, jnp.minimum(j, i), 0)),
            pl.BlockSpec((1, num_heads, tk, hd),
                         lambda b, i, j: (b, 0, jnp.minimum(j, i), 0)),
        ],
        out_specs=(
            pl.BlockSpec((1, tq, H), lambda b, i, j: (b, i, 0)),
            pl.BlockSpec((1, num_heads, tq, 1), lambda b, i, j: (b, 0, i, 0)),
        ),
        scratch_shapes=[
            pltpu.VMEM((num_heads, tq, 1), jnp.float32),    # running max m
            pltpu.VMEM((num_heads, tq, 1), jnp.float32),    # running sum l
            pltpu.VMEM((num_heads, tq, hd), jnp.float32),   # output accumulator
        ],
        compiler_params=pltpu.CompilerParams(
            dimension_semantics=("parallel", "parallel", "arbitrary"),
            vmem_limit_bytes=_VMEM_LIMIT),
    )(qh, kh, vh)

    # ---- output projection (ctx already in (B, S, H) layout) ----------------
    out = pl.pallas_call(
        _out_proj_kernel,
        out_shape=jax.ShapeDtypeStruct((B, S, E), jnp.float32),
        grid=(B, S // ts),
        in_specs=[
            pl.BlockSpec((1, ts, H), lambda b, s: (b, s, 0)),
            pl.BlockSpec((H, E), lambda b, s: (0, 0)),
            pl.BlockSpec((1, E), lambda b, s: (0, 0)),
        ],
        out_specs=pl.BlockSpec((1, ts, E), lambda b, s: (b, s, 0)),
        compiler_params=proj_params,
    )(ctx, wo_bf, params["bo"])

    if not return_attn:
        return out, None

    # ---- attention weights (kv-tiled aux kernel; bf16 to halve S^2 writeback)
    attn_kernel = functools.partial(_attn_weights_kernel, tq=tq, tk=tk)
    attn = pl.pallas_call(
        attn_kernel,
        out_shape=jax.ShapeDtypeStruct((B, num_heads, S, S), jnp.bfloat16),
        grid=(B, S // tq, S // tk),
        in_specs=[
            pl.BlockSpec((1, num_heads, tq, hd),
                         lambda b, i, j: (b, 0, i, 0)),
            pl.BlockSpec((1, num_heads, tk, hd),
                         lambda b, i, j: (b, 0, jnp.minimum(j, i), 0)),
            pl.BlockSpec((1, num_heads, tq, 1),
                         lambda b, i, j: (b, 0, i, 0)),
        ],
        out_specs=pl.BlockSpec((1, num_heads, tq, tk),
                               lambda b, i, j: (b, 0, i, j)),
        compiler_params=pltpu.CompilerParams(
            dimension_semantics=("parallel", "parallel", "arbitrary"),
            vmem_limit_bytes=_VMEM_LIMIT),
    )(qh, kh, lse)

    return out, attn


# ---------------------------------------------------------------------------
# Params + pure-JAX f32 reference (mirrors the PyTorch forward)
# ---------------------------------------------------------------------------
def init_params(key, embed_dim, hidden_dim):
    """Weights stored [in, out] (pre-transposed vs torch.nn.Linear)."""
    ks = jax.random.split(key, 8)
    def lin(kw, kb, fan_in, fan_out):
        bound = 1.0 / math.sqrt(fan_in)
        w = jax.random.uniform(kw, (fan_in, fan_out), jnp.float32, -bound, bound)
        b = jax.random.uniform(kb, (1, fan_out), jnp.float32, -bound, bound)
        return w, b
    wq, bq = lin(ks[0], ks[1], embed_dim, hidden_dim)
    wk, bk = lin(ks[2], ks[3], embed_dim, hidden_dim)
    wv, bv = lin(ks[4], ks[5], embed_dim, hidden_dim)
    wo, bo = lin(ks[6], ks[7], hidden_dim, embed_dim)
    return dict(wq=wq, bq=bq, wk=wk, bk=bk, wv=wv, bv=bv, wo=wo, bo=bo)


def reference_mha(x, params, *, num_heads):
    B, S, E = x.shape
    H = params["wq"].shape[1]
    hd = H // num_heads
    q = x @ params["wq"] + params["bq"]
    k = x @ params["wk"] + params["bk"]
    v = x @ params["wv"] + params["bv"]
    q = q.reshape(B, S, num_heads, hd).transpose(0, 2, 1, 3)
    k = k.reshape(B, S, num_heads, hd).transpose(0, 2, 1, 3)
    v = v.reshape(B, S, num_heads, hd).transpose(0, 2, 1, 3)
    scores = jnp.einsum("bhqd,bhkd->bhqk", q, k) / math.sqrt(hd)
    mask = jnp.triu(jnp.ones((S, S), bool), k=1)
    scores = jnp.where(mask[None, None], -jnp.inf, scores)
    attn = jax.nn.softmax(scores, axis=-1)
    ctx = jnp.einsum("bhqk,bhkd->bhqd", attn, v)
    ctx = ctx.transpose(0, 2, 1, 3).reshape(B, S, H)
    out = ctx @ params["wo"] + params["bo"]
    return out, attn


if __name__ == "__main__":
    B, S, E, H, NH = 2, 8, 32, 32, 4
    key = jax.random.PRNGKey(0)
    kx, kp = jax.random.split(key)
    x = jax.random.normal(kx, (B, S, E), jnp.float32)
    params = init_params(kp, E, H)

    mha = jax.jit(functools.partial(masked_mha, num_heads=NH))
    out, attn = mha(x, params)
    out = jax.block_until_ready(out)
    attn = jax.block_until_ready(attn)

    ref_out, ref_attn = reference_mha(x, params, num_heads=NH)
    assert out.shape == (B, S, E) and attn.shape == (B, NH, S, S)
    # bf16 MXU operands / bf16 attn storage with f32 accumulation -> compare
    # to the pure-f32 reference with mixed-precision tolerances.
    assert jnp.allclose(out, ref_out, atol=5e-2, rtol=5e-2), "output mismatch"
    assert jnp.allclose(attn.astype(jnp.float32), ref_attn,
                        atol=3e-2, rtol=3e-2), "attn mismatch"

    print("KERNEL_OK")
</pallas_src>

<mosaic_0001>
module attributes {stable_mosaic.version = 11 : i64} {
  func.func @_qkv_proj_kernel(%arg0: i32, %arg1: i32, %arg2: memref<1x8x32xbf16, #tpu.memory_space<vmem>>, %arg3: memref<32x96xbf16, #tpu.memory_space<vmem>>, %arg4: memref<1x96xf32, #tpu.memory_space<vmem>>, %arg5: memref<1x4x8x8xbf16, #tpu.memory_space<vmem>>, %arg6: memref<1x4x8x8xbf16, #tpu.memory_space<vmem>>, %arg7: memref<1x4x8x8xbf16, #tpu.memory_space<vmem>>) attributes {dimension_semantics = [#tpu.dimension_semantics<parallel>, #tpu.dimension_semantics<parallel>], iteration_bounds = array<i64: 2, 1>, scalar_prefetch = 0 : i64, scratch_operands = 0 : i64, tpu.core_type = #tpu.core_type<tc>, window_params = [{transform_indices = @transform_0, window_bounds = array<i64: 1, 8, 32>}, {pipeline_mode = #tpu.pipeline_mode<synchronous>, transform_indices = @transform_1, window_bounds = array<i64: 32, 96>}, {pipeline_mode = #tpu.pipeline_mode<synchronous>, transform_indices = @transform_2, window_bounds = array<i64: 1, 96>}, {transform_indices = @transform_3, window_bounds = array<i64: 1, 4, 8, 8>}, {transform_indices = @transform_4, window_bounds = array<i64: 1, 4, 8, 8>}, {transform_indices = @transform_5, window_bounds = array<i64: 1, 4, 8, 8>}]} {
    %c0 = arith.constant 0 : index
    %c0_0 = arith.constant 0 : index
    %c0_1 = arith.constant 0 : index
    %0 = vector.load %arg2[%c0, %c0_0, %c0_1] : memref<1x8x32xbf16, #tpu.memory_space<vmem>>, vector<1x8x32xbf16>
    %1 = vector.shape_cast %0 : vector<1x8x32xbf16> to vector<8x32xbf16>
    %c0_2 = arith.constant 0 : index
    %c0_3 = arith.constant 0 : index
    %2 = vector.load %arg3[%c0_2, %c0_3] : memref<32x96xbf16, #tpu.memory_space<vmem>>, vector<32x96xbf16>
    %cst = arith.constant dense<0.000000e+00> : vector<8x96xf32>
    %3 = tpu.matmul %1, %2, %cst {dimension_numbers = #tpu.dot_dimension_numbers<[1], [0], [0], [1], [0, 0, 1, 1], [], []>} : vector<8x32xbf16>, vector<32x96xbf16>, vector<8x96xf32> -> vector<8x96xf32>
    %c0_4 = arith.constant 0 : index
    %c0_5 = arith.constant 0 : index
    %4 = vector.load %arg4[%c0_4, %c0_5] : memref<1x96xf32, #tpu.memory_space<vmem>>, vector<1x96xf32>
    %5 = vector.broadcast %4 : vector<1x96xf32> to vector<8x96xf32>
    %6 = arith.addf %3, %5 : vector<8x96xf32>
    %7 = vector.extract_strided_slice %6 {offsets = [0, 0], sizes = [8, 32], strides = [1, 1]} : vector<8x96xf32> to vector<8x32xf32>
    %8 = vector.shape_cast %7 : vector<8x32xf32> to vector<8x4x8xf32>
    %9 = tpu.transpose %8, [1, 0, 2] : vector<8x4x8xf32> -> vector<4x8x8xf32>
    %10 = arith.truncf %9 : vector<4x8x8xf32> to vector<4x8x8xbf16>
    %c0_6 = arith.constant 0 : index
    %c0_7 = arith.constant 0 : index
    %c0_8 = arith.constant 0 : index
    %c0_9 = arith.constant 0 : index
    %11 = vector.load %arg5[%c0_6, %c0_7, %c0_8, %c0_9] : memref<1x4x8x8xbf16, #tpu.memory_space<vmem>>, vector<1x4x8x8xbf16>
    %12 = vector.shape_cast %11 : vector<1x4x8x8xbf16> to vector<4x8x8xbf16>
    %13 = vector.shape_cast %10 : vector<4x8x8xbf16> to vector<1x4x8x8xbf16>
    tpu.vector_store %arg5[%c0_6, %c0_7, %c0_8, %c0_9], %13 {strides = array<i32>} : memref<1x4x8x8xbf16, #tpu.memory_space<vmem>>, vector<1x4x8x8xbf16>,
    %14 = vector.extract_strided_slice %6 {offsets = [0, 32], sizes = [8, 32], strides = [1, 1]} : vector<8x96xf32> to vector<8x32xf32>
    %15 = vector.shape_cast %14 : vector<8x32xf32> to vector<8x4x8xf32>
    %16 = tpu.transpose %15, [1, 0, 2] : vector<8x4x8xf32> -> vector<4x8x8xf32>
    %17 = arith.truncf %16 : vector<4x8x8xf32> to vector<4x8x8xbf16>
    %c0_10 = arith.constant 0 : index
    %c0_11 = arith.constant 0 : index
    %c0_12 = arith.constant 0 : index
    %c0_13 = arith.constant 0 : index
    %18 = vector.load %arg6[%c0_10, %c0_11, %c0_12, %c0_13] : memref<1x4x8x8xbf16, #tpu.memory_space<vmem>>, vector<1x4x8x8xbf16>
    %19 = vector.shape_cast %18 : vector<1x4x8x8xbf16> to vector<4x8x8xbf16>
    %20 = vector.shape_cast %17 : vector<4x8x8xbf16> to vector<1x4x8x8xbf16>
    tpu.vector_store %arg6[%c0_10, %c0_11, %c0_12, %c0_13], %20 {strides = array<i32>} : memref<1x4x8x8xbf16, #tpu.memory_space<vmem>>, vector<1x4x8x8xbf16>,
    %21 = vector.extract_strided_slice %6 {offsets = [0, 64], sizes = [8, 32], strides = [1, 1]} : vector<8x96xf32> to vector<8x32xf32>
    %22 = vector.shape_cast %21 : vector<8x32xf32> to vector<8x4x8xf32>
    %23 = tpu.transpose %22, [1, 0, 2] : vector<8x4x8xf32> -> vector<4x8x8xf32>
    %24 = arith.truncf %23 : vector<4x8x8xf32> to vector<4x8x8xbf16>
    %c0_14 = arith.constant 0 : index
    %c0_15 = arith.constant 0 : index
    %c0_16 = arith.constant 0 : index
    %c0_17 = arith.constant 0 : index
    %25 = vector.load %arg7[%c0_14, %c0_15, %c0_16, %c0_17] : memref<1x4x8x8xbf16, #tpu.memory_space<vmem>>, vector<1x4x8x8xbf16>
    %26 = vector.shape_cast %25 : vector<1x4x8x8xbf16> to vector<4x8x8xbf16>
    %27 = vector.shape_cast %24 : vector<4x8x8xbf16> to vector<1x4x8x8xbf16>
    tpu.vector_store %arg7[%c0_14, %c0_15, %c0_16, %c0_17], %27 {strides = array<i32>} : memref<1x4x8x8xbf16, #tpu.memory_space<vmem>>, vector<1x4x8x8xbf16>,
    return
  }
  func.func @transform_0(%arg0: i32, %arg1: i32) -> (i32, i32, i32) {
    %c0_i32 = arith.constant 0 : i32
    %c0_i32_0 = arith.constant 0 : i32
    return %arg0, %arg1, %c0_i32 : i32, i32, i32
  }
  func.func @transform_1(%arg0: i32, %arg1: i32) -> (i32, i32) {
    %c0_i32 = arith.constant 0 : i32
    %c0_i32_0 = arith.constant 0 : i32
    %c0_i32_1 = arith.constant 0 : i32
    return %c0_i32, %c0_i32_0 : i32, i32
  }
  func.func @transform_2(%arg0: i32, %arg1: i32) -> (i32, i32) {
    %c0_i32 = arith.constant 0 : i32
    %c0_i32_0 = arith.constant 0 : i32
    %c0_i32_1 = arith.constant 0 : i32
    return %c0_i32, %c0_i32_0 : i32, i32
  }
  func.func @transform_3(%arg0: i32, %arg1: i32) -> (i32, i32, i32, i32) {
    %c0_i32 = arith.constant 0 : i32
    %c0_i32_0 = arith.constant 0 : i32
    %c0_i32_1 = arith.constant 0 : i32
    return %arg0, %c0_i32, %arg1, %c0_i32_0 : i32, i32, i32, i32
  }
  func.func @transform_4(%arg0: i32, %arg1: i32) -> (i32, i32, i32, i32) {
    %c0_i32 = arith.constant 0 : i32
    %c0_i32_0 = arith.constant 0 : i32
    %c0_i32_1 = arith.constant 0 : i32
    return %arg0, %c0_i32, %arg1, %c0_i32_0 : i32, i32, i32, i32
  }
  func.func @transform_5(%arg0: i32, %arg1: i32) -> (i32, i32, i32, i32) {
    %c0_i32 = arith.constant 0 : i32
    %c0_i32_0 = arith.constant 0 : i32
    %c0_i32_1 = arith.constant 0 : i32
    return %arg0, %c0_i32, %arg1, %c0_i32_0 : i32, i32, i32, i32
  }
}

module attributes {stable_mosaic.version = 11 : i64} {
  func.func @_out_proj_kernel(%arg0: i32, %arg1: i32, %arg2: memref<1x8x32xbf16, #tpu.memory_space<vmem>>, %arg3: memref<32x32xbf16, #tpu.memory_space<vmem>>, %arg4: memref<1x32xf32, #tpu.memory_space<vmem>>, %arg5: memref<1x8x32xf32, #tpu.memory_space<vmem>>) attributes {dimension_semantics = [#tpu.dimension_semantics<parallel>, #tpu.dimension_semantics<parallel>], iteration_bounds = array<i64: 2, 1>, scalar_prefetch = 0 : i64, scratch_operands = 0 : i64, tpu.core_type = #tpu.core_type<tc>, window_params = [{transform_indices = @transform_0, window_bounds = array<i64: 1, 8, 32>}, {pipeline_mode = #tpu.pipeline_mode<synchronous>, transform_indices = @transform_1, window_bounds = array<i64: 32, 32>}, {pipeline_mode = #tpu.pipeline_mode<synchronous>, transform_indices = @transform_2, window_bounds = array<i64: 1, 32>}, {transform_indices = @transform_3, window_bounds = array<i64: 1, 8, 32>}]} {
    %c0 = arith.constant 0 : index
    %c0_0 = arith.constant 0 : index
    %c0_1 = arith.constant 0 : index
    %0 = vector.load %arg2[%c0, %c0_0, %c0_1] : memref<1x8x32xbf16, #tpu.memory_space<vmem>>, vector<1x8x32xbf16>
    %1 = vector.shape_cast %0 : vector<1x8x32xbf16> to vector<8x32xbf16>
    %c0_2 = arith.constant 0 : index
    %c0_3 = arith.constant 0 : index
    %2 = vector.load %arg3[%c0_2, %c0_3] : memref<32x32xbf16, #tpu.memory_space<vmem>>, vector<32x32xbf16>
    %cst = arith.constant dense<0.000000e+00> : vector<8x32xf32>
    %3 = tpu.matmul %1, %2, %cst {dimension_numbers = #tpu.dot_dimension_numbers<[1], [0], [0], [1], [0, 0, 1, 1], [], []>} : vector<8x32xbf16>, vector<32x32xbf16>, vector<8x32xf32> -> vector<8x32xf32>
    %c0_4 = arith.constant 0 : index
    %c0_5 = arith.constant 0 : index
    %4 = vector.load %arg4[%c0_4, %c0_5] : memref<1x32xf32, #tpu.memory_space<vmem>>, vector<1x32xf32>
    %5 = vector.broadcast %4 : vector<1x32xf32> to vector<8x32xf32>
    %6 = arith.addf %3, %5 : vector<8x32xf32>
    %c0_6 = arith.constant 0 : index
    %c0_7 = arith.constant 0 : index
    %c0_8 = arith.constant 0 : index
    %7 = vector.load %arg5[%c0_6, %c0_7, %c0_8] : memref<1x8x32xf32, #tpu.memory_space<vmem>>, vector<1x8x32xf32>
    %8 = vector.shape_cast %7 : vector<1x8x32xf32> to vector<8x32xf32>
    %9 = vector.shape_cast %6 : vector<8x32xf32> to vector<1x8x32xf32>
    tpu.vector_store %arg5[%c0_6, %c0_7, %c0_8], %9 {strides = array<i32>} : memref<1x8x32xf32, #tpu.memory_space<vmem>>, vector<1x8x32xf32>,
    return
  }
  func.func @transform_0(%arg0: i32, %arg1: i32) -> (i32, i32, i32) {
    %c0_i32 = arith.constant 0 : i32
    %c0_i32_0 = arith.constant 0 : i32
    return %arg0, %arg1, %c0_i32 : i32, i32, i32
  }
  func.func @transform_1(%arg0: i32, %arg1: i32) -> (i32, i32) {
    %c0_i32 = arith.constant 0 : i32
    %c0_i32_0 = arith.constant 0 : i32
    %c0_i32_1 = arith.constant 0 : i32
    return %c0_i32, %c0_i32_0 : i32, i32
  }
  func.func @transform_2(%arg0: i32, %arg1: i32) -> (i32, i32) {
    %c0_i32 = arith.constant 0 : i32
    %c0_i32_0 = arith.constant 0 : i32
    %c0_i32_1 = arith.constant 0 : i32
    return %c0_i32, %c0_i32_0 : i32, i32
  }
  func.func @transform_3(%arg0: i32, %arg1: i32) -> (i32, i32, i32) {
    %c0_i32 = arith.constant 0 : i32
    %c0_i32_0 = arith.constant 0 : i32
    return %arg0, %arg1, %c0_i32 : i32, i32, i32
  }
}

module attributes {stable_mosaic.version = 11 : i64} {
  func.func @_flash_attn_kernel(%arg0: i32, %arg1: i32, %arg2: i32, %arg3: memref<1x4x8x8xbf16, #tpu.memory_space<vmem>>, %arg4: memref<1x4x8x8xbf16, #tpu.memory_space<vmem>>, %arg5: memref<1x4x8x8xbf16, #tpu.memory_space<vmem>>, %arg6: memref<1x8x32xbf16, #tpu.memory_space<vmem>>, %arg7: memref<1x4x8x1xf32, #tpu.memory_space<vmem>>, %arg8: memref<4x8x1xf32, #tpu.memory_space<vmem>>, %arg9: memref<4x8x1xf32, #tpu.memory_space<vmem>>, %arg10: memref<4x8x8xf32, #tpu.memory_space<vmem>>) attributes {dimension_semantics = [#tpu.dimension_semantics<parallel>, #tpu.dimension_semantics<parallel>, #tpu.dimension_semantics<arbitrary>], iteration_bounds = array<i64: 2, 1, 1>, scalar_prefetch = 0 : i64, scratch_operands = 3 : i64, tpu.core_type = #tpu.core_type<tc>, window_params = [{transform_indices = @transform_0, window_bounds = array<i64: 1, 4, 8, 8>}, {transform_indices = @transform_1, window_bounds = array<i64: 1, 4, 8, 8>}, {transform_indices = @transform_2, window_bounds = array<i64: 1, 4, 8, 8>}, {transform_indices = @transform_3, window_bounds = array<i64: 1, 8, 32>}, {transform_indices = @transform_4, window_bounds = array<i64: 1, 4, 8, 1>}]} {
    %c0_i32 = arith.constant 0 : i32
    %0 = arith.cmpi eq, %arg2, %c0_i32 : i32
    %1 = arith.extui %0 : i1 to i32
    %c0_i32_0 = arith.constant 0 : i32
    %2 = arith.cmpi ne, %1, %c0_i32_0 : i32
    scf.if %2 {
      %cst = arith.constant -1.000000e+30 : f32
      %9 = vector.broadcast %cst : f32 to vector<4x8x1xf32>
      %c0 = arith.constant 0 : index
      %c0_3 = arith.constant 0 : index
      %c0_4 = arith.constant 0 : index
      %10 = vector.load %arg8[%c0, %c0_3, %c0_4] : memref<4x8x1xf32, #tpu.memory_space<vmem>>, vector<4x8x1xf32>
      tpu.vector_store %arg8[%c0, %c0_3, %c0_4], %9 {strides = array<i32>} : memref<4x8x1xf32, #tpu.memory_space<vmem>>, vector<4x8x1xf32>,
      %cst_5 = arith.constant 0.000000e+00 : f32
      %11 = vector.broadcast %cst_5 : f32 to vector<4x8x1xf32>
      %c0_6 = arith.constant 0 : index
      %c0_7 = arith.constant 0 : index
      %c0_8 = arith.constant 0 : index
      %12 = vector.load %arg9[%c0_6, %c0_7, %c0_8] : memref<4x8x1xf32, #tpu.memory_space<vmem>>, vector<4x8x1xf32>
      tpu.vector_store %arg9[%c0_6, %c0_7, %c0_8], %11 {strides = array<i32>} : memref<4x8x1xf32, #tpu.memory_space<vmem>>, vector<4x8x1xf32>,
      %cst_9 = arith.constant 0.000000e+00 : f32
      %13 = vector.broadcast %cst_9 : f32 to vector<4x8x8xf32>
      %c0_10 = arith.constant 0 : index
      %c0_11 = arith.constant 0 : index
      %c0_12 = arith.constant 0 : index
      %14 = vector.load %arg10[%c0_10, %c0_11, %c0_12] : memref<4x8x8xf32, #tpu.memory_space<vmem>>, vector<4x8x8xf32>
      tpu.vector_store %arg10[%c0_10, %c0_11, %c0_12], %13 {strides = array<i32>} : memref<4x8x8xf32, #tpu.memory_space<vmem>>, vector<4x8x8xf32>,
    } else {
    }
    %3 = arith.cmpi sle, %arg2, %arg1 : i32
    %4 = arith.extui %3 : i1 to i32
    %c0_i32_1 = arith.constant 0 : i32
    %5 = arith.cmpi ne, %4, %c0_i32_1 : i32
    scf.if %5 {
      %c0 = arith.constant 0 : index
      %c0_3 = arith.constant 0 : index
      %c0_4 = arith.constant 0 : index
      %c0_5 = arith.constant 0 : index
      %9 = vector.load %arg3[%c0, %c0_3, %c0_4, %c0_5] : memref<1x4x8x8xbf16, #tpu.memory_space<vmem>>, vector<1x4x8x8xbf16>
      %10 = vector.shape_cast %9 : vector<1x4x8x8xbf16> to vector<4x8x8xbf16>
      %c0_6 = arith.constant 0 : index
      %c0_7 = arith.constant 0 : index
      %c0_8 = arith.constant 0 : index
      %c0_9 = arith.constant 0 : index
      %11 = vector.load %arg4[%c0_6, %c0_7, %c0_8, %c0_9] : memref<1x4x8x8xbf16, #tpu.memory_space<vmem>>, vector<1x4x8x8xbf16>
      %12 = vector.shape_cast %11 : vector<1x4x8x8xbf16> to vector<4x8x8xbf16>
      %c0_10 = arith.constant 0 : index
      %c0_11 = arith.constant 0 : index
      %c0_12 = arith.constant 0 : index
      %c0_13 = arith.constant 0 : index
      %13 = vector.load %arg5[%c0_10, %c0_11, %c0_12, %c0_13] : memref<1x4x8x8xbf16, #tpu.memory_space<vmem>>, vector<1x4x8x8xbf16>
      %14 = vector.shape_cast %13 : vector<1x4x8x8xbf16> to vector<4x8x8xbf16>
      "tpu.trace_start"() <{level = 10 : i32, message = "hqd,hkd->hqk"}> : () -> ()
      %cst = arith.constant dense<0.000000e+00> : vector<4x8x8xf32>
      %15 = tpu.matmul %10, %12, %cst {dimension_numbers = #tpu.dot_dimension_numbers<[2], [2], [1], [1], [0, 0, 0, 1, 1, 1], [0], [0]>} : vector<4x8x8xbf16>, vector<4x8x8xbf16>, vector<4x8x8xf32> -> vector<4x8x8xf32>
      "tpu.trace_stop"() : () -> ()
      %16 = arith.cmpi slt, %arg2, %arg1 : i32
      %17 = arith.extui %16 : i1 to i32
      %c0_i32_14 = arith.constant 0 : i32
      %18 = arith.cmpi ne, %17, %c0_i32_14 : i32
      scf.if %18 {
        %c0_16 = arith.constant 0 : index
        %c0_17 = arith.constant 0 : index
        %c0_18 = arith.constant 0 : index
        %22 = vector.load %arg8[%c0_16, %c0_17, %c0_18] : memref<4x8x1xf32, #tpu.memory_space<vmem>>, vector<4x8x1xf32>
        %cst_19 = arith.constant dense<0xFF800000> : vector<4x8xf32>
        %23 = vector.multi_reduction <maximumf>, %15, %cst_19 [2] : vector<4x8x8xf32> to vector<4x8xf32>
        %24 = vector.shape_cast %23 : vector<4x8xf32> to vector<4x8x1xf32>
        %25 = arith.maximumf %22, %24 : vector<4x8x1xf32>
        %26 = arith.subf %22, %25 : vector<4x8x1xf32>
        %27 = math.exp %26 : vector<4x8x1xf32>
        %28 = vector.broadcast %25 : vector<4x8x1xf32> to vector<4x8x8xf32>
        %29 = arith.subf %15, %28 : vector<4x8x8xf32>
        %30 = math.exp %29 : vector<4x8x8xf32>
        %c0_20 = arith.constant 0 : index
        %c0_21 = arith.constant 0 : index
        %c0_22 = arith.constant 0 : index
        %31 = vector.load %arg9[%c0_20, %c0_21, %c0_22] : memref<4x8x1xf32, #tpu.memory_space<vmem>>, vector<4x8x1xf32>
        %32 = arith.mulf %27, %31 : vector<4x8x1xf32>
        %cst_23 = arith.constant dense<0.000000e+00> : vector<4x8xf32>
        %33 = vector.multi_reduction <add>, %30, %cst_23 [2] : vector<4x8x8xf32> to vector<4x8xf32>
        %34 = vector.shape_cast %33 : vector<4x8xf32> to vector<4x8x1xf32>
        %35 = arith.addf %32, %34 : vector<4x8x1xf32>
        %c0_24 = arith.constant 0 : index
        %c0_25 = arith.constant 0 : index
        %c0_26 = arith.constant 0 : index
        %36 = vector.load %arg9[%c0_24, %c0_25, %c0_26] : memref<4x8x1xf32, #tpu.memory_space<vmem>>, vector<4x8x1xf32>
        tpu.vector_store %arg9[%c0_24, %c0_25, %c0_26], %35 {strides = array<i32>} : memref<4x8x1xf32, #tpu.memory_space<vmem>>, vector<4x8x1xf32>,
        %c0_27 = arith.constant 0 : index
        %c0_28 = arith.constant 0 : index
        %c0_29 = arith.constant 0 : index
        %37 = vector.load %arg10[%c0_27, %c0_28, %c0_29] : memref<4x8x8xf32, #tpu.memory_space<vmem>>, vector<4x8x8xf32>
        %38 = vector.broadcast %27 : vector<4x8x1xf32> to vector<4x8x8xf32>
        %39 = arith.mulf %38, %37 : vector<4x8x8xf32>
        %40 = arith.truncf %30 : vector<4x8x8xf32> to vector<4x8x8xbf16>
        "tpu.trace_start"() <{level = 10 : i32, message = "hqk,hkd->hqd"}> : () -> ()
        %cst_30 = arith.constant dense<0.000000e+00> : vector<4x8x8xf32>
        %41 = tpu.matmul %40, %14, %cst_30 {dimension_numbers = #tpu.dot_dimension_numbers<[2], [1], [1], [2], [0, 0, 0, 1, 1, 2], [0], [0]>} : vector<4x8x8xbf16>, vector<4x8x8xbf16>, vector<4x8x8xf32> -> vector<4x8x8xf32>
        "tpu.trace_stop"() : () -> ()
        %42 = arith.addf %39, %41 : vector<4x8x8xf32>
        %c0_31 = arith.constant 0 : index
        %c0_32 = arith.constant 0 : index
        %c0_33 = arith.constant 0 : index
        %43 = vector.load %arg10[%c0_31, %c0_32, %c0_33] : memref<4x8x8xf32, #tpu.memory_space<vmem>>, vector<4x8x8xf32>
        tpu.vector_store %arg10[%c0_31, %c0_32, %c0_33], %42 {strides = array<i32>} : memref<4x8x8xf32, #tpu.memory_space<vmem>>, vector<4x8x8xf32>,
        %c0_34 = arith.constant 0 : index
        %c0_35 = arith.constant 0 : index
        %c0_36 = arith.constant 0 : index
        %44 = vector.load %arg8[%c0_34, %c0_35, %c0_36] : memref<4x8x1xf32, #tpu.memory_space<vmem>>, vector<4x8x1xf32>
        tpu.vector_store %arg8[%c0_34, %c0_35, %c0_36], %25 {strides = array<i32>} : memref<4x8x1xf32, #tpu.memory_space<vmem>>, vector<4x8x1xf32>,
      } else {
      }
      %19 = arith.cmpi eq, %arg2, %arg1 : i32
      %20 = arith.extui %19 : i1 to i32
      %c0_i32_15 = arith.constant 0 : i32
      %21 = arith.cmpi ne, %20, %c0_i32_15 : i32
      scf.if %21 {
        %22 = tpu.iota {dimensions = array<i32: 0>} : vector<8x8xi32>
        %23 = tpu.iota {dimensions = array<i32: 1>} : vector<8x8xi32>
        %24 = arith.cmpi sgt, %23, %22 : vector<8x8xi32>
        %25 = vector.shape_cast %24 : vector<8x8xi1> to vector<1x8x8xi1>
        %cst_16 = arith.constant -1.000000e+30 : f32
        %26 = vector.shape_cast %25 : vector<1x8x8xi1> to vector<1x8x8xi1>
        %27 = vector.broadcast %26 : vector<1x8x8xi1> to vector<4x8x8xi1>
        %28 = vector.broadcast %cst_16 : f32 to vector<4x8x8xf32>
        %29 = arith.select %27, %28, %15 : vector<4x8x8xi1>, vector<4x8x8xf32>
        %c0_17 = arith.constant 0 : index
        %c0_18 = arith.constant 0 : index
        %c0_19 = arith.constant 0 : index
        %30 = vector.load %arg8[%c0_17, %c0_18, %c0_19] : memref<4x8x1xf32, #tpu.memory_space<vmem>>, vector<4x8x1xf32>
        %cst_20 = arith.constant dense<0xFF800000> : vector<4x8xf32>
        %31 = vector.multi_reduction <maximumf>, %29, %cst_20 [2] : vector<4x8x8xf32> to vector<4x8xf32>
        %32 = vector.shape_cast %31 : vector<4x8xf32> to vector<4x8x1xf32>
        %33 = arith.maximumf %30, %32 : vector<4x8x1xf32>
        %34 = arith.subf %30, %33 : vector<4x8x1xf32>
        %35 = math.exp %34 : vector<4x8x1xf32>
        %36 = vector.broadcast %33 : vector<4x8x1xf32> to vector<4x8x8xf32>
        %37 = arith.subf %29, %36 : vector<4x8x8xf32>
        %38 = math.exp %37 : vector<4x8x8xf32>
        %c0_21 = arith.constant 0 : index
        %c0_22 = arith.constant 0 : index
        %c0_23 = arith.constant 0 : index
        %39 = vector.load %arg9[%c0_21, %c0_22, %c0_23] : memref<4x8x1xf32, #tpu.memory_space<vmem>>, vector<4x8x1xf32>
        %40 = arith.mulf %35, %39 : vector<4x8x1xf32>
        %cst_24 = arith.constant dense<0.000000e+00> : vector<4x8xf32>
        %41 = vector.multi_reduction <add>, %38, %cst_24 [2] : vector<4x8x8xf32> to vector<4x8xf32>
        %42 = vector.shape_cast %41 : vector<4x8xf32> to vector<4x8x1xf32>
        %43 = arith.addf %40, %42 : vector<4x8x1xf32>
        %c0_25 = arith.constant 0 : index
        %c0_26 = arith.constant 0 : index
        %c0_27 = arith.constant 0 : index
        %44 = vector.load %arg9[%c0_25, %c0_26, %c0_27] : memref<4x8x1xf32, #tpu.memory_space<vmem>>, vector<4x8x1xf32>
        tpu.vector_store %arg9[%c0_25, %c0_26, %c0_27], %43 {strides = array<i32>} : memref<4x8x1xf32, #tpu.memory_space<vmem>>, vector<4x8x1xf32>,
        %c0_28 = arith.constant 0 : index
        %c0_29 = arith.constant 0 : index
        %c0_30 = arith.constant 0 : index
        %45 = vector.load %arg10[%c0_28, %c0_29, %c0_30] : memref<4x8x8xf32, #tpu.memory_space<vmem>>, vector<4x8x8xf32>
        %46 = vector.broadcast %35 : vector<4x8x1xf32> to vector<4x8x8xf32>
        %47 = arith.mulf %46, %45 : vector<4x8x8xf32>
        %48 = arith.truncf %38 : vector<4x8x8xf32> to vector<4x8x8xbf16>
        "tpu.trace_start"() <{level = 10 : i32, message = "hqk,hkd->hqd"}> : () -> ()
        %cst_31 = arith.constant dense<0.000000e+00> : vector<4x8x8xf32>
        %49 = tpu.matmul %48, %14, %cst_31 {dimension_numbers = #tpu.dot_dimension_numbers<[2], [1], [1], [2], [0, 0, 0, 1, 1, 2], [0], [0]>} : vector<4x8x8xbf16>, vector<4x8x8xbf16>, vector<4x8x8xf32> -> vector<4x8x8xf32>
        "tpu.trace_stop"() : () -> ()
        %50 = arith.addf %47, %49 : vector<4x8x8xf32>
        %c0_32 = arith.constant 0 : index
        %c0_33 = arith.constant 0 : index
        %c0_34 = arith.constant 0 : index
        %51 = vector.load %arg10[%c0_32, %c0_33, %c0_34] : memref<4x8x8xf32, #tpu.memory_space<vmem>>, vector<4x8x8xf32>
        tpu.vector_store %arg10[%c0_32, %c0_33, %c0_34], %50 {strides = array<i32>} : memref<4x8x8xf32, #tpu.memory_space<vmem>>, vector<4x8x8xf32>,
        %c0_35 = arith.constant 0 : index
        %c0_36 = arith.constant 0 : index
        %c0_37 = arith.constant 0 : index
        %52 = vector.load %arg8[%c0_35, %c0_36, %c0_37] : memref<4x8x1xf32, #tpu.memory_space<vmem>>, vector<4x8x1xf32>
        tpu.vector_store %arg8[%c0_35, %c0_36, %c0_37], %33 {strides = array<i32>} : memref<4x8x1xf32, #tpu.memory_space<vmem>>, vector<4x8x1xf32>,
      } else {
      }
    } else {
    }
    %6 = arith.cmpi eq, %arg2, %arg1 : i32
    %7 = arith.extui %6 : i1 to i32
    %c0_i32_2 = arith.constant 0 : i32
    %8 = arith.cmpi ne, %7, %c0_i32_2 : i32
    scf.if %8 {
      %c0 = arith.constant 0 : index
      %c0_3 = arith.constant 0 : index
      %c0_4 = arith.constant 0 : index
      %9 = vector.load %arg9[%c0, %c0_3, %c0_4] : memref<4x8x1xf32, #tpu.memory_space<vmem>>, vector<4x8x1xf32>
      %10 = tpu.reciprocal %9 {approx = true} : vector<4x8x1xf32> -> vector<4x8x1xf32>
      %c0_5 = arith.constant 0 : index
      %c0_6 = arith.constant 0 : index
      %c0_7 = arith.constant 0 : index
      %11 = vector.load %arg10[%c0_5, %c0_6, %c0_7] : memref<4x8x8xf32, #tpu.memory_space<vmem>>, vector<4x8x8xf32>
      %12 = vector.broadcast %10 : vector<4x8x1xf32> to vector<4x8x8xf32>
      %13 = arith.mulf %11, %12 : vector<4x8x8xf32>
      %14 = tpu.transpose %13, [1, 0, 2] : vector<4x8x8xf32> -> vector<8x4x8xf32>
      %15 = vector.shape_cast %14 : vector<8x4x8xf32> to vector<8x32xf32>
      %16 = arith.truncf %15 : vector<8x32xf32> to vector<8x32xbf16>
      %c0_8 = arith.constant 0 : index
      %c0_9 = arith.constant 0 : index
      %c0_10 = arith.constant 0 : index
      %17 = vector.load %arg6[%c0_8, %c0_9, %c0_10] : memref<1x8x32xbf16, #tpu.memory_space<vmem>>, vector<1x8x32xbf16>
      %18 = vector.shape_cast %17 : vector<1x8x32xbf16> to vector<8x32xbf16>
      %19 = vector.shape_cast %16 : vector<8x32xbf16> to vector<1x8x32xbf16>
      tpu.vector_store %arg6[%c0_8, %c0_9, %c0_10], %19 {strides = array<i32>} : memref<1x8x32xbf16, #tpu.memory_space<vmem>>, vector<1x8x32xbf16>,
      %c0_11 = arith.constant 0 : index
      %c0_12 = arith.constant 0 : index
      %c0_13 = arith.constant 0 : index
      %20 = vector.load %arg8[%c0_11, %c0_12, %c0_13] : memref<4x8x1xf32, #tpu.memory_space<vmem>>, vector<4x8x1xf32>
      %c0_14 = arith.constant 0 : index
      %c0_15 = arith.constant 0 : index
      %c0_16 = arith.constant 0 : index
      %21 = vector.load %arg9[%c0_14, %c0_15, %c0_16] : memref<4x8x1xf32, #tpu.memory_space<vmem>>, vector<4x8x1xf32>
      %22 = math.log %21 : vector<4x8x1xf32>
      %23 = arith.addf %20, %22 : vector<4x8x1xf32>
      %c0_17 = arith.constant 0 : index
      %c0_18 = arith.constant 0 : index
      %c0_19 = arith.constant 0 : index
      %c0_20 = arith.constant 0 : index
      %24 = vector.load %arg7[%c0_17, %c0_18, %c0_19, %c0_20] : memref<1x4x8x1xf32, #tpu.memory_space<vmem>>, vector<1x4x8x1xf32>
      %25 = vector.shape_cast %24 : vector<1x4x8x1xf32> to vector<4x8x1xf32>
      %26 = vector.shape_cast %23 : vector<4x8x1xf32> to vector<1x4x8x1xf32>
      tpu.vector_store %arg7[%c0_17, %c0_18, %c0_19, %c0_20], %26 {strides = array<i32>} : memref<1x4x8x1xf32, #tpu.memory_space<vmem>>, vector<1x4x8x1xf32>,
    } else {
    }
    return
  }
  func.func @transform_0(%arg0: i32, %arg1: i32, %arg2: i32) -> (i32, i32, i32, i32) {
    %c0_i32 = arith.constant 0 : i32
    %c0_i32_0 = arith.constant 0 : i32
    %c0_i32_1 = arith.constant 0 : i32
    return %arg0, %c0_i32, %arg1, %c0_i32_0 : i32, i32, i32, i32
  }
  func.func @transform_1(%arg0: i32, %arg1: i32, %arg2: i32) -> (i32, i32, i32, i32) {
    %0 = arith.minsi %arg2, %arg1 : i32
    %c0_i32 = arith.constant 0 : i32
    %c0_i32_0 = arith.constant 0 : i32
    %c0_i32_1 = arith.constant 0 : i32
    return %arg0, %c0_i32, %0, %c0_i32_0 : i32, i32, i32, i32
  }
  func.func @transform_2(%arg0: i32, %arg1: i32, %arg2: i32) -> (i32, i32, i32, i32) {
    %0 = arith.minsi %arg2, %arg1 : i32
    %c0_i32 = arith.constant 0 : i32
    %c0_i32_0 = arith.constant 0 : i32
    %c0_i32_1 = arith.constant 0 : i32
    return %arg0, %c0_i32, %0, %c0_i32_0 : i32, i32, i32, i32
  }
  func.func @transform_3(%arg0: i32, %arg1: i32, %arg2: i32) -> (i32, i32, i32) {
    %c0_i32 = arith.constant 0 : i32
    %c0_i32_0 = arith.constant 0 : i32
    return %arg0, %arg1, %c0_i32 : i32, i32, i32
  }
  func.func @transform_4(%arg0: i32, %arg1: i32, %arg2: i32) -> (i32, i32, i32, i32) {
    %c0_i32 = arith.constant 0 : i32
    %c0_i32_0 = arith.constant 0 : i32
    %c0_i32_1 = arith.constant 0 : i32
    return %arg0, %c0_i32, %arg1, %c0_i32_0 : i32, i32, i32, i32
  }
}

module attributes {stable_mosaic.version = 11 : i64} {
  func.func @_attn_weights_kernel(%arg0: i32, %arg1: i32, %arg2: i32, %arg3: memref<1x4x8x8xbf16, #tpu.memory_space<vmem>>, %arg4: memref<1x4x8x8xbf16, #tpu.memory_space<vmem>>, %arg5: memref<1x4x8x1xf32, #tpu.memory_space<vmem>>, %arg6: memref<1x4x8x8xbf16, #tpu.memory_space<vmem>>) attributes {dimension_semantics = [#tpu.dimension_semantics<parallel>, #tpu.dimension_semantics<parallel>, #tpu.dimension_semantics<arbitrary>], iteration_bounds = array<i64: 2, 1, 1>, scalar_prefetch = 0 : i64, scratch_operands = 0 : i64, tpu.core_type = #tpu.core_type<tc>, window_params = [{transform_indices = @transform_0, window_bounds = array<i64: 1, 4, 8, 8>}, {transform_indices = @transform_1, window_bounds = array<i64: 1, 4, 8, 8>}, {transform_indices = @transform_2, window_bounds = array<i64: 1, 4, 8, 1>}, {transform_indices = @transform_3, window_bounds = array<i64: 1, 4, 8, 8>}]} {
    %0 = arith.cmpi sgt, %arg2, %arg1 : i32
    %1 = arith.extui %0 : i1 to i32
    %c0_i32 = arith.constant 0 : i32
    %2 = arith.cmpi ne, %1, %c0_i32 : i32
    scf.if %2 {
      %cst = arith.constant 0.000000e+00 : bf16
      %6 = vector.broadcast %cst : bf16 to vector<1x4x8x8xbf16>
      %c0 = arith.constant 0 : index
      %c0_1 = arith.constant 0 : index
      %c0_2 = arith.constant 0 : index
      %c0_3 = arith.constant 0 : index
      %7 = vector.load %arg6[%c0, %c0_1, %c0_2, %c0_3] : memref<1x4x8x8xbf16, #tpu.memory_space<vmem>>, vector<1x4x8x8xbf16>
      tpu.vector_store %arg6[%c0, %c0_1, %c0_2, %c0_3], %6 {strides = array<i32>} : memref<1x4x8x8xbf16, #tpu.memory_space<vmem>>, vector<1x4x8x8xbf16>,
    } else {
    }
    %3 = arith.cmpi sle, %arg2, %arg1 : i32
    %4 = arith.extui %3 : i1 to i32
    %c0_i32_0 = arith.constant 0 : i32
    %5 = arith.cmpi ne, %4, %c0_i32_0 : i32
    scf.if %5 {
      %c0 = arith.constant 0 : index
      %c0_1 = arith.constant 0 : index
      %c0_2 = arith.constant 0 : index
      %c0_3 = arith.constant 0 : index
      %6 = vector.load %arg3[%c0, %c0_1, %c0_2, %c0_3] : memref<1x4x8x8xbf16, #tpu.memory_space<vmem>>, vector<1x4x8x8xbf16>
      %7 = vector.shape_cast %6 : vector<1x4x8x8xbf16> to vector<4x8x8xbf16>
      %c0_4 = arith.constant 0 : index
      %c0_5 = arith.constant 0 : index
      %c0_6 = arith.constant 0 : index
      %c0_7 = arith.constant 0 : index
      %8 = vector.load %arg4[%c0_4, %c0_5, %c0_6, %c0_7] : memref<1x4x8x8xbf16, #tpu.memory_space<vmem>>, vector<1x4x8x8xbf16>
      %9 = vector.shape_cast %8 : vector<1x4x8x8xbf16> to vector<4x8x8xbf16>
      "tpu.trace_start"() <{level = 10 : i32, message = "hqd,hkd->hqk"}> : () -> ()
      %cst = arith.constant dense<0.000000e+00> : vector<4x8x8xf32>
      %10 = tpu.matmul %7, %9, %cst {dimension_numbers = #tpu.dot_dimension_numbers<[2], [2], [1], [1], [0, 0, 0, 1, 1, 1], [0], [0]>} : vector<4x8x8xbf16>, vector<4x8x8xbf16>, vector<4x8x8xf32> -> vector<4x8x8xf32>
      "tpu.trace_stop"() : () -> ()
      %c0_8 = arith.constant 0 : index
      %c0_9 = arith.constant 0 : index
      %c0_10 = arith.constant 0 : index
      %c0_11 = arith.constant 0 : index
      %11 = vector.load %arg5[%c0_8, %c0_9, %c0_10, %c0_11] : memref<1x4x8x1xf32, #tpu.memory_space<vmem>>, vector<1x4x8x1xf32>
      %12 = vector.shape_cast %11 : vector<1x4x8x1xf32> to vector<4x8x1xf32>
      %13 = vector.broadcast %12 : vector<4x8x1xf32> to vector<4x8x8xf32>
      %14 = arith.subf %10, %13 : vector<4x8x8xf32>
      %15 = math.exp %14 : vector<4x8x8xf32>
      %16 = arith.cmpi slt, %arg2, %arg1 : i32
      %17 = arith.extui %16 : i1 to i32
      %c0_i32_12 = arith.constant 0 : i32
      %18 = arith.cmpi ne, %17, %c0_i32_12 : i32
      scf.if %18 {
        %22 = arith.truncf %15 : vector<4x8x8xf32> to vector<4x8x8xbf16>
        %c0_14 = arith.constant 0 : index
        %c0_15 = arith.constant 0 : index
        %c0_16 = arith.constant 0 : index
        %c0_17 = arith.constant 0 : index
        %23 = vector.load %arg6[%c0_14, %c0_15, %c0_16, %c0_17] : memref<1x4x8x8xbf16, #tpu.memory_space<vmem>>, vector<1x4x8x8xbf16>
        %24 = vector.shape_cast %23 : vector<1x4x8x8xbf16> to vector<4x8x8xbf16>
        %25 = vector.shape_cast %22 : vector<4x8x8xbf16> to vector<1x4x8x8xbf16>
        tpu.vector_store %arg6[%c0_14, %c0_15, %c0_16, %c0_17], %25 {strides = array<i32>} : memref<1x4x8x8xbf16, #tpu.memory_space<vmem>>, vector<1x4x8x8xbf16>,
      } else {
      }
      %19 = arith.cmpi eq, %arg2, %arg1 : i32
      %20 = arith.extui %19 : i1 to i32
      %c0_i32_13 = arith.constant 0 : i32
      %21 = arith.cmpi ne, %20, %c0_i32_13 : i32
      scf.if %21 {
        %22 = tpu.iota {dimensions = array<i32: 0>} : vector<8x8xi32>
        %23 = tpu.iota {dimensions = array<i32: 1>} : vector<8x8xi32>
        %24 = arith.cmpi sgt, %23, %22 : vector<8x8xi32>
        %25 = vector.shape_cast %24 : vector<8x8xi1> to vector<1x8x8xi1>
        %cst_14 = arith.constant 0.000000e+00 : f32
        %26 = vector.shape_cast %25 : vector<1x8x8xi1> to vector<1x8x8xi1>
        %27 = vector.broadcast %26 : vector<1x8x8xi1> to vector<4x8x8xi1>
        %28 = vector.broadcast %cst_14 : f32 to vector<4x8x8xf32>
        %29 = arith.select %27, %28, %15 : vector<4x8x8xi1>, vector<4x8x8xf32>
        %30 = arith.truncf %29 : vector<4x8x8xf32> to vector<4x8x8xbf16>
        %c0_15 = arith.constant 0 : index
        %c0_16 = arith.constant 0 : index
        %c0_17 = arith.constant 0 : index
        %c0_18 = arith.constant 0 : index
        %31 = vector.load %arg6[%c0_15, %c0_16, %c0_17, %c0_18] : memref<1x4x8x8xbf16, #tpu.memory_space<vmem>>, vector<1x4x8x8xbf16>
        %32 = vector.shape_cast %31 : vector<1x4x8x8xbf16> to vector<4x8x8xbf16>
        %33 = vector.shape_cast %30 : vector<4x8x8xbf16> to vector<1x4x8x8xbf16>
        tpu.vector_store %arg6[%c0_15, %c0_16, %c0_17, %c0_18], %33 {strides = array<i32>} : memref<1x4x8x8xbf16, #tpu.memory_space<vmem>>, vector<1x4x8x8xbf16>,
      } else {
      }
    } else {
    }
    return
  }
  func.func @transform_0(%arg0: i32, %arg1: i32, %arg2: i32) -> (i32, i32, i32, i32) {
    %c0_i32 = arith.constant 0 : i32
    %c0_i32_0 = arith.constant 0 : i32
    %c0_i32_1 = arith.constant 0 : i32
    return %arg0, %c0_i32, %arg1, %c0_i32_0 : i32, i32, i32, i32
  }
  func.func @transform_1(%arg0: i32, %arg1: i32, %arg2: i32) -> (i32, i32, i32, i32) {
    %0 = arith.minsi %arg2, %arg1 : i32
    %c0_i32 = arith.constant 0 : i32
    %c0_i32_0 = arith.constant 0 : i32
    %c0_i32_1 = arith.constant 0 : i32
    return %arg0, %c0_i32, %0, %c0_i32_0 : i32, i32, i32, i32
  }
  func.func @transform_2(%arg0: i32, %arg1: i32, %arg2: i32) -> (i32, i32, i32, i32) {
    %c0_i32 = arith.constant 0 : i32
    %c0_i32_0 = arith.constant 0 : i32
    %c0_i32_1 = arith.constant 0 : i32
    return %arg0, %c0_i32, %arg1, %c0_i32_0 : i32, i32, i32, i32
  }
  func.func @transform_3(%arg0: i32, %arg1: i32, %arg2: i32) -> (i32, i32, i32, i32) {
    %c0_i32 = arith.constant 0 : i32
    %c0_i32_0 = arith.constant 0 : i32
    return %arg0, %c0_i32, %arg1, %arg2 : i32, i32, i32, i32
  }
}

</mosaic_0001>

<bundles_post_ra>
// kernel: masked_mha.6
= control target key start
LH: loop header
LB: loop body
LE: loop exit
PB: predicated region body
PF: predicated region fallthrough
CT: control target
= control target key end

     0   :  { %8 = vsyncpa [#allocation3], 0  ;;  %s653_s0 = inlined_call_operand.vmem [shape: bf16[2,8,32], index: 0, kind: input, shape index: {}]   ;;  %s654_s1 = inlined_call_operand.vmem [shape: bf16[32,32], index: 1, kind: input, shape index: {}]   ;;  %s655_s2 = inlined_call_operand.vmem [shape: f32[1,32], index: 2, kind: input, shape index: {}]   ;;  %s656_s3 = inlined_call_operand.hbm [shape: f32[2,8,32], index: 3, kind: output, shape index: {}]  }
   0x1   :  { %10 = vsyncpa [#allocation3 + $0x1], 0  ;;  %s533_s12 = smov 0   ;;  %s535_s13 = smov 0  }
   0x2   :  { %s537_s14 = smov 0   ;;  %s539_s15 = smov 0  }
   0x3   :  { %s541_s16 = smov 0   ;;  %s543_s17 = smov 0  }
   0x4 LB: > { %s347_s18 = sadd.s32 4294967295, %s508_s17   ;;  %s348_s19 = sadd.s32 4294967294, %s508_s17   ;;  %s508_s17 = sphi %s543_s17, %s16_s17   ;;  %s504_s16 = sphi %s541_s16, %s663_s16   ;;  %s500_s15 = sphi %s539_s15, %s662_s15   ;;  %s496_s14 = sphi %s537_s14, %s661_s14   ;;  %s492_s13 = sphi %s535_s13, %s660_s13   ;;  %s488_s12 = sphi %s533_s12, %s659_s12  }
   0x5   : > { %s28_s20 = sadd.s32 1, %s504_s16  ;;  %s107_s21 = sadd.s32 1, %s496_s14 }
   0x6   : > { %p30_p0 = scmp.ge.s32.totalorder %s28_s20, 2  ;;  %p117_p1 = scmp.ne.s32.totalorder %s496_s14, %s492_s13 }
   0x7   : > { %p118_p2 = scmp.eq.s32.totalorder %s347_s18, 1  ;;  %p123_p3 = scmp.ne.s32.totalorder %s492_s13, %s488_s12 }
   0x8   : > { %s665_s20 = smov (%p30_p0, %s28_s20), 0  ;;  %p124_p5 = scmp.eq.s32.totalorder %s348_s19, 1 }
   0x9   : > { %p573_p4 = por %p118_p2, %p117_p1  ;;  %s102_s23 = ssub.s32 %s504_s16, %s665_s20 }
   0xa   : > { %p351_p6 = scmp.ge.s32.totalorder %s508_s17, 1  ;;  %p105_p7 = scmp.eq.s32.totalorder %s102_s23, 0 }
   0xb   : > { %p580_p8 = por %p124_p5, %p123_p3  ;;  %p158_p9 = scmp.lt.s32.totalorder %s508_s17, 3 }
   0xc   : > { %s586_s25 = scalar_select %p105_p7, %s496_s14, %s107_s21  }
   0xd   : > { %p159_p10 = pnand %p351_p6, %p158_p9 }
   0xe   : > { %p184_p11 = scmp.lt.s32.totalorder (!%p159_p10), %s500_s15, 1  ;;  %s181_s8 = sand.u32 (!%p159_p10), 1, %s492_s13  }
   0xf   : > { %162 = sbr.rel (%p159_p10) target bundleno = 238 (0xee), region = 32  ;;  %s352_s9 = sshll.u32 (!%p159_p10), %s181_s8, 3 }
  0x10   : > { %s359_s18 = sshll.u32 (!%p159_p10), %s500_s15, 7  ;;  %s183_s19 = scalar_lea.vmem (!%p159_p10), [#allocation2], %s352_s9 }
  0x11   : > { %s276_s21 = sshll.u32 (!%p159_p10), %s183_s19, 4  ;;  %s607_s27 = scalar_lea.hbm (!%p159_p10), %s656_s3, %s359_s18  ;;  %s609_s21 = int_to_ptr.vmem [resolvable:$true] %s276_s21 }
  0x12   : > { %s262_s28 = scalar_lea.sflag (!%p159_p10), [#allocation3], %s181_s8  ;;  %s432_s29 = scalar_lea.vmem (!%p159_p10), %s609_s21, 128 }
  0x13   : > { %p433_p12 = scmp.ne.s32.totalorder (!%p159_p10), %s609_s21, %s432_s29 }
  0x14   : > { %v430_v0 = vld [vmem:[%s654_s1 + $0x8] sm:$0xff]   ;;  %v510_v1 = vmov 0.0   ;;  %v431_v2 = vld [vmem:[%s654_s1] sm:$0xff]   ;;  %vm511_vm0 = vmmov 0   ;;  %s185_s30 = scalar_select %p184_p11, %s500_s15, 1  ;;  %vm216_vm1 = vcmask 261120  }
  0x15   : > { %365 = vmatprep.subr.bf16.mxu0 %v510_v1  ;;  %369 = vmatprep.mubr.msk.bf16.mxu0 %vm511_vm0, %v510_v1  ;;  %v354_v4 = vld [vmem:[%s655_s2] ss:$0 sm:$0xff]  ;;  %p434_p13 = pnand %p433_p12, %p573_p4  ;;  %s512_s15 = smov [#allocation2]  }
  0x16   : > { %366 = vmatpush3.bf16.msra.mxu0 %v430_v0  ;;  %s353_s4 = sshll.u32 %s185_s30, 2  ;;  %s436_s30 = sshll.u32 %s512_s15, 4  ;;  %s437_s30 = int_to_ptr.vmem [resolvable:$false] %s436_s30 }
  0x17   : > { %367 = vmatprep.subr.bf16.mxu0 %v510_v1  ;;  %s190_s7 = scalar_lea.vmem %s653_s0, %s353_s4  ;;  %p435_p0 = pneg %p434_p13 }
  0x18   : > { %v192_v3 = vld [vmem:[%s190_s7] sm:$0xf]  ;;  %s438_s4 = scalar_lea.vmem %s437_s30, 256  ;;  %p439_p1 = scmp.lt.s32.totalorder %s609_s21, %s437_s30 }
  0x19   : > { %p440_p2 = scmp.lt.s32.totalorder %s438_s4, %s432_s29 }
  0x1a   : > { %368 = vmatpush3.bf16.msra.mxu0 %v431_v2 }
  0x1b   : > { %p441_p3 = por %p440_p2, %p439_p1 }
  0x1d   : > { %370 = vmatmul.mubr.msk.bf16.vlgmr.msra.gmra.mxu0 %vm216_vm1, %v192_v3  ;;  %p442_p5 = pnand %p441_p3, %p435_p0 }
  0xdd   : > { %v254_v5 = vpop.f32.mrf.mxu0 }
  0xde   : > { %v255_v6 = vadd.f32 %v354_v4, %v254_v5 }
  0xdf   : > { %v371_v7 = vpop.f32.mrf.mxu0 }
  0xe0   : > { %260 = vst.msk [vmem:[%s183_s19] sm:$0xff] %vm216_vm1, %v255_v6 }
  0xe1   : > { %v257_v8 = vpop.f32.mrf.mxu0 }
  0xe2   : > { %445 = shalt.err (!%p442_p5)
}
  0xe3   : > { %s446_s5 = scalar_lea.hbm %s607_s27, 128  ;;  %s450_s8 = scalar_lea.hbm %s656_s3, 256 }
  0xe4   : > { %p447_p6 = scmp.ne.s32.totalorder %s607_s27, %s446_s5  ;;  %p451_p10 = scmp.lt.s32.totalorder %s607_s27, %s656_s3 }
  0xe5   : > { %p452_p11 = scmp.lt.s32.totalorder %s450_s8, %s446_s5 }
  0xe6   : > { %p448_p7 = pnand %p447_p6, %p573_p4 }
  0xe7   : > { %p453_p12 = por %p452_p11, %p451_p10 }
  0xe8   : > { %p449_p9 = pneg %p448_p7 }
  0xea   : > { %p454_p13 = pnand %p453_p12, %p449_p9 }
  0xec   : > { %457 = shalt.err (!%p454_p13)
}
  0xed   : > { %373 = dma.vmem_to_hbm [thread:$0]  (%p573_p4), %s609_s21, 128, %s607_s27, %s262_s28   ;;  %v372_v9 = vpop.f32.mrf.mxu0 }
  0xee PF: > { %p379_p0 = scmp.ge.s32.totalorder %s508_s17, 2  ;;  %s288_s11 = sand.u32 1, %s488_s12  }
  0xef   : > { %s289_s18 = scalar_lea.sflag [#allocation3], %s288_s11 }
  0xf0   : > { %p376_p1 = pnand %p379_p0, %p580_p8 }
  0xf2   : > { %p377_p2 = pneg %p376_p1 }
  0xf4   : > { %483 = dma.done.wait (%p377_p2), %s289_s18, 128  }
  0xf5   : > { %485 = vsyncadd (%p377_p2), %s289_s18, 4294967168  ;;  %s16_s17 = sadd.s32 1, %s508_s17   ;;  %s659_s12 = smov %s492_s13 }
  0xf6   : > { %p13_p3 = scmp.ge.s32.totalorder %s16_s17, 4   ;;  %s660_s13 = smov %s496_s14 }
  0xf7   : > { %s661_s14 = smov %s586_s25  ;;  %s662_s15 = smov %s504_s16 }
  0xf8   : > { %s663_s16 = smov %s665_s20  ;;  %15 = sbr.rel (!%p13_p3) target bundleno = 4 (0x4), region = 67 }
  0xfd   :  { %294 = vsyncpa [#allocation3], 1 }
  0xfe   :  { %296 = vsyncpa [#allocation3 + $0x1], 1 }

// kernel: masked_mha.4
= control target key start
LH: loop header
LB: loop body
LE: loop exit
PB: predicated region body
PF: predicated region fallthrough
CT: control target
= control target key end

     0   :  { %s1140_s18 = smov 0   ;;  %s1142_s19 = smov 0   ;;  %s1265_s0 = inlined_call_operand.vmem [shape: bf16[2,8,32], index: 0, kind: input, shape index: {}]   ;;  %s1266_s1 = inlined_call_operand.vmem [shape: bf16[32,96], index: 1, kind: input, shape index: {}]   ;;  %s1267_s2 = inlined_call_operand.vmem [shape: f32[1,96], index: 2, kind: input, shape index: {}]   ;;  %s1268_s3 = inlined_call_operand.vmem [shape: bf16[2,4,8,8], index: 3, kind: output, shape index: {0}]   ;;  %s1269_s4 = inlined_call_operand.vmem [shape: bf16[2,4,8,8], index: 4, kind: output, shape index: {1}]   ;;  %s1270_s5 = inlined_call_operand.vmem [shape: bf16[2,4,8,8], index: 5, kind: output, shape index: {2}]  }
   0x1   :  { %s1144_s20 = smov 0  }
   0x2 LB: > { %s28_s21 = sadd.s32 1, %s1095_s19  ;;  %p1008_p0 = scmp.ge.s32.totalorder %s1099_s20, 1  ;;  %s1099_s20 = sphi %s1144_s20, %s16_s20   ;;  %s1095_s19 = sphi %s1142_s19, %s1272_s19   ;;  %s1091_s18 = sphi %s1140_s18, %s1271_s18  }
   0x3   : > { %p30_p1 = scmp.ge.s32.totalorder %s28_s21, 2  ;;  %p214_p2 = scmp.lt.s32.totalorder %s1099_s20, 3 }
   0x5   : > { %s1274_s21 = smov (%p30_p1, %s28_s21), 0  ;;  %p215_p3 = pnand %p1008_p0, %p214_p2 }
   0x6   : > { %p263_p4 = scmp.lt.s32.totalorder (!%p215_p3), %s1091_s18, 1  ;;  %s1103_s7 = smov (!%p215_p3), 104  }
   0x7   : > { %218 = sbr.rel (%p215_p3) target bundleno = 481 (0x1e1), region = 32  ;;  %s1104_s8 = smov (!%p215_p3), 120  }
   0x8   : > { %s1105_s9 = smov (!%p215_p3), 96   ;;  %s1106_s10 = smov (!%p215_p3), 112  }
   0x9   : > { %s1107_s11 = smov (!%p215_p3), 64  }
   0xc   : > { %v1075_v0 = vld [vmem:[%s1266_s1 + $0x8] sm:$0xff]   ;;  %v1101_v1 = vmov 0.0   ;;  %v1076_v2 = vld [vmem:[%s1266_s1] sm:$0xff]   ;;  %vm1102_vm0 = vmmov 0   ;;  %s1276_s18 = smov (!%p263_p4, %s1091_s18), 1  ;;  %vm319_vm1 = vcmask 261120   ;;  %v378_v12 = vlaneseq }
   0xd   : > { %1034 = vmatprep.subr.bf16.mxu0 %v1101_v1  ;;  %1038 = vmatprep.mubr.msk.bf16.mxu0 %vm1102_vm0, %v1101_v1  ;;  %s1009_s26 = sshll.u32 %s1276_s18, 2  ;;  %v1016_v4 = vld [vmem:[%s1267_s2] ss:$0 sm:$0xff]  ;;  %v1108_v10 = vmov 1983009808   ;;  %s1194_s12 = sshll.u32 %s1276_s18, 4 }
   0xe   : > { %1035 = vmatpush3.bf16.msra.mxu0 %v1075_v0  ;;  %s269_s29 = scalar_lea.vmem %s1265_s0, %s1009_s26  ;;  %v376_v11 = vunpack.c.l.s4 %v1108_v10  ;;  %v1109_v13 = vmov 1934713408   ;;  %v379_v16 = vshrl.u32 %v378_v12, 7  ;;  %s277_s15 = scalar_lea.vmem %s1268_s3, %s1194_s12  ;;  %vm513_vm2 = vcmask 60416  }
   0xf   : > { %1036 = vmatprep.subr.bf16.mxu0 %v1101_v1  ;;  %v295_v3 = vld [vmem:[%s269_s29] sm:$0xf]  ;;  %v408_v14 = vunpack.c.l.s4 %v1109_v13  ;;  %s285_s18 = scalar_lea.vmem %s1269_s4, %s1194_s12  ;;  %s293_s24 = scalar_lea.vmem %s1270_s5, %s1194_s12 }
  0x10   : > { %v377_v15 = vunpack.c.0.s8 %v376_v11 }
  0x11   : > { %v409_v19 = vunpack.c.0.s8 %v408_v14 }
  0x12   : > { %1037 = vmatpush3.bf16.msra.mxu0 %v1076_v2  ;;  %v1174_v20 = vsub.s32 %v377_v15, %v379_v16 }
  0x13   : > { %v1176_v26 = vsub.s32 %v409_v19, %v379_v16 }
  0x15   : > { %1039 = vmatmul.mubr.msk.bf16.vlgmr.msra.gmra.mxu0 %vm319_vm1, %v295_v3 }
  0xd5   : > { %v357_v5 = vpop.f32.mrf.mxu0 }
  0xd6   : > { %v358_v6 = vadd.f32 %v1016_v4, %v357_v5 }
  0xd7   : > { %v1040_v7 = vpop.f32.mrf.mxu0 }
  0xd8   : > { %370 = vrot.lane.b32.xlu1 %v358_v6, %s1103_s7  ;;  %364 = vrot.lane.b32.xlu0 %v358_v6, %s1104_s8 }
  0xd9   : > { %v360_v8 = vpop.f32.mrf.mxu0 }
  0xdb   : > { %v1041_v9 = vpop.f32.mrf.mxu0 }
  0xdc   : > { %518 = vrot.lane.b32.xlu1 %v358_v6, %s1105_s9  ;;  %367 = vrot.lane.b32.xlu0 %v358_v6, %s1106_s10 }
  0xe0   : > { %674 = vrot.lane.b32.xlu1 %v358_v6, %s1107_s11 }
 0x14a   : > { %v371_v17 = vpop.permute.xlu1 %370  ;;  %v365_v18 = vpop.permute.xlu0 %364 }
 0x14b   : > { %520 = vrot.lane.b32.xlu0 %v365_v18, %s1105_s9  ;;  %v389_v21 = vcombine.low %v365_v18, %v371_v17  ;;  %v390_v22 = vcombine.high %v365_v18, %v371_v17 }
 0x14d   : > { %v397_v27 = vrot.slane %v389_v21, %v1174_v20  ;;  %v404_v28 = vrot.slane %v390_v22, %v1174_v20 }
 0x14e   : > { %v368_v23 = vpop.permute.xlu0 %367  ;;  %v519_v63 = vpop.permute.xlu1 %518 }
 0x14f   : > { %v373_v24 = vcombine.low %v358_v6, %v368_v23  ;;  %v374_v25 = vcombine.high %v358_v6, %v368_v23  ;;  %524 = vrot.lane.b32.xlu0 %v371_v17, %s1105_s9  ;;  %522 = vrot.lane.b32.xlu1 %v368_v23, %s1105_s9 }
 0x151   : > { %v381_v29 = vrot.slane %v373_v24, %v1174_v20  ;;  %v388_v30 = vrot.slane %v374_v25, %v1174_v20 }
 0x152   : > { %v675_v0 = vpop.permute.xlu1 %674 }
 0x153   : > { %v405_v31 = vcombine.low %v381_v29, %v397_v27  ;;  %v406_v32 = vcombine.high %v381_v29, %v397_v27  ;;  %v421_v33 = vcombine.low %v388_v30, %v404_v28  ;;  %v422_v34 = vcombine.high %v388_v30, %v404_v28  ;;  %676 = vrot.lane.b32.xlu0 %v365_v18, %s1107_s11 }
 0x154   : > { %678 = vrot.lane.b32.xlu1 %v368_v23, %s1107_s11 }
 0x155   : > { %v413_v35 = vrot.slane %v405_v31, %v1176_v26  ;;  %v420_v36 = vrot.slane %v406_v32, %v1176_v26  ;;  %v429_v37 = vrot.slane %v421_v33, %v1176_v26  ;;  %v436_v38 = vrot.slane %v422_v34, %v1176_v26 }
 0x157   : > { %v441_v39 = vcombine.low %v413_v35, %v420_v36  ;;  %v1020_v40 = vcombine.high %v413_v35, %v420_v36  ;;  %v457_v41 = vcombine.low %v429_v37, %v436_v38  ;;  %v1021_v42 = vcombine.high %v429_v37, %v436_v38  ;;  %680 = vrot.lane.b32.xlu0 %v371_v17, %s1107_s11 }
 0x159   : > { %v448_v43 = vrot.slane %v441_v39, %v1174_v20  ;;  %v456_v44 = vrot.slane %v1020_v40, %v1174_v20  ;;  %v464_v45 = vrot.slane %v457_v41, %v1174_v20  ;;  %v472_v46 = vrot.slane %v1021_v42, %v1174_v20 }
 0x15b   : > { %v473_v47 = vcombine.low %v448_v43, %v456_v44  ;;  %v474_v48 = vcombine.high %v448_v43, %v456_v44  ;;  %v489_v49 = vcombine.low %v464_v45, %v472_v46  ;;  %v490_v50 = vcombine.high %v464_v45, %v472_v46 }
 0x15d   : > { %v481_v51 = vrot.slane %v473_v47, %v1176_v26  ;;  %v488_v52 = vrot.slane %v474_v48, %v1176_v26  ;;  %v497_v53 = vrot.slane %v489_v49, %v1176_v26  ;;  %v504_v54 = vrot.slane %v490_v50, %v1176_v26 }
 0x15f   : > { %v505_v55 = vcombine.low %v481_v51, %v497_v53  ;;  %v506_v56 = vcombine.high %v481_v51, %v497_v53  ;;  %v507_v57 = vcombine.low %v488_v52, %v504_v54  ;;  %v508_v58 = vcombine.high %v488_v52, %v504_v54 }
 0x161   : > { %v509_v59 = vpack.c.bf16 %v505_v55, %v505_v55  ;;  %v510_v60 = vpack.c.bf16 %v506_v56, %v506_v56  ;;  %v511_v61 = vpack.c.bf16 %v507_v57, %v507_v57  ;;  %v512_v62 = vpack.c.bf16 %v508_v58, %v508_v58 }
 0x163   : > { %514 = vst.msk [vmem:[%s277_s15] sm:$0xf] %vm513_vm2, %v509_v59  ;;  %515 = vst.msk [vmem:[%s277_s15 + $0x4] sm:$0xf] %vm513_vm2, %v510_v60 }
 0x164   : > { %516 = vst.msk [vmem:[%s277_s15 + $0x8] sm:$0xf] %vm513_vm2, %v511_v61  ;;  %517 = vst.msk [vmem:[%s277_s15 + $0xc] sm:$0xf] %vm513_vm2, %v512_v62 }
 0x1bd   : > { %v521_v1 = vpop.permute.xlu0 %520 }
 0x1c1   : > { %v523_v2 = vpop.permute.xlu1 %522  ;;  %v525_v3 = vpop.permute.xlu0 %524 }
 0x1c2   : > { %v530_v4 = vcombine.low %v519_v63, %v523_v2  ;;  %v531_v5 = vcombine.high %v519_v63, %v523_v2  ;;  %v546_v6 = vcombine.low %v521_v1, %v525_v3  ;;  %v547_v7 = vcombine.high %v521_v1, %v525_v3 }
 0x1c4   : > { %v538_v8 = vrot.slane %v530_v4, %v1174_v20  ;;  %v545_v9 = vrot.slane %v531_v5, %v1174_v20  ;;  %v554_v10 = vrot.slane %v546_v6, %v1174_v20  ;;  %v561_v11 = vrot.slane %v547_v7, %v1174_v20 }
 0x1c5   : > { %v677_v12 = vpop.permute.xlu0 %676 }
 0x1c6   : > { %v562_v13 = vcombine.low %v538_v8, %v554_v10  ;;  %v563_v14 = vcombine.high %v538_v8, %v554_v10  ;;  %v578_v15 = vcombine.low %v545_v9, %v561_v11  ;;  %v579_v16 = vcombine.high %v545_v9, %v561_v11  ;;  %v679_v17 = vpop.permute.xlu1 %678 }
 0x1c7   : > { %v686_v23 = vcombine.low %v675_v0, %v679_v17  ;;  %v687_v24 = vcombine.high %v675_v0, %v679_v17 }
 0x1c8   : > { %v570_v18 = vrot.slane %v562_v13, %v1176_v26  ;;  %v577_v19 = vrot.slane %v563_v14, %v1176_v26  ;;  %v586_v21 = vrot.slane %v578_v15, %v1176_v26  ;;  %v593_v22 = vrot.slane %v579_v16, %v1176_v26 }
 0x1c9   : > { %v681_v25 = vpop.permute.xlu0 %680  ;;  %v694_v37 = vrot.slane %v686_v23, %v1174_v20  ;;  %v701_v38 = vrot.slane %v687_v24, %v1174_v20 }
 0x1ca   : > { %v598_v27 = vcombine.low %v570_v18, %v577_v19  ;;  %v1022_v28 = vcombine.high %v570_v18, %v577_v19  ;;  %v614_v29 = vcombine.low %v586_v21, %v593_v22  ;;  %v1023_v30 = vcombine.high %v586_v21, %v593_v22 }
 0x1cb   : > { %v702_v31 = vcombine.low %v677_v12, %v681_v25  ;;  %v703_v32 = vcombine.high %v677_v12, %v681_v25 }
 0x1cc   : > { %v605_v33 = vrot.slane %v598_v27, %v1174_v20  ;;  %v613_v34 = vrot.slane %v1022_v28, %v1174_v20  ;;  %v621_v35 = vrot.slane %v614_v29, %v1174_v20  ;;  %v629_v36 = vrot.slane %v1023_v30, %v1174_v20 }
 0x1cd   : > { %v710_v39 = vrot.slane %v702_v31, %v1174_v20  ;;  %v717_v40 = vrot.slane %v703_v32, %v1174_v20 }
 0x1ce   : > { %v630_v41 = vcombine.low %v605_v33, %v613_v34  ;;  %v631_v42 = vcombine.high %v605_v33, %v613_v34  ;;  %v646_v43 = vcombine.low %v621_v35, %v629_v36  ;;  %v647_v44 = vcombine.high %v621_v35, %v629_v36 }
 0x1cf   : > { %v718_v45 = vcombine.low %v694_v37, %v710_v39  ;;  %v719_v46 = vcombine.high %v694_v37, %v710_v39  ;;  %v734_v47 = vcombine.low %v701_v38, %v717_v40  ;;  %v735_v48 = vcombine.high %v701_v38, %v717_v40 }
 0x1d0   : > { %v638_v49 = vrot.slane %v630_v41, %v1176_v26  ;;  %v645_v50 = vrot.slane %v631_v42, %v1176_v26  ;;  %v654_v51 = vrot.slane %v646_v43, %v1176_v26  ;;  %v661_v52 = vrot.slane %v647_v44, %v1176_v26 }
 0x1d1   : > { %v726_v53 = vrot.slane %v718_v45, %v1176_v26  ;;  %v733_v54 = vrot.slane %v719_v46, %v1176_v26  ;;  %v742_v55 = vrot.slane %v734_v47, %v1176_v26  ;;  %v749_v56 = vrot.slane %v735_v48, %v1176_v26 }
 0x1d2   : > { %v662_v57 = vcombine.low %v638_v49, %v654_v51  ;;  %v663_v58 = vcombine.high %v638_v49, %v654_v51  ;;  %v664_v59 = vcombine.low %v645_v50, %v661_v52  ;;  %v665_v60 = vcombine.high %v645_v50, %v661_v52 }
 0x1d3   : > { %v754_v61 = vcombine.low %v726_v53, %v733_v54  ;;  %v1024_v62 = vcombine.high %v726_v53, %v733_v54  ;;  %v770_v63 = vcombine.low %v742_v55, %v749_v56  ;;  %v1025_v0 = vcombine.high %v742_v55, %v749_v56 }
 0x1d4   : > { %v666_v1 = vpack.c.bf16 %v662_v57, %v662_v57  ;;  %v667_v2 = vpack.c.bf16 %v663_v58, %v663_v58  ;;  %v668_v3 = vpack.c.bf16 %v664_v59, %v664_v59  ;;  %v669_v4 = vpack.c.bf16 %v665_v60, %v665_v60 }
 0x1d5   : > { %v761_v5 = vrot.slane %v754_v61, %v1174_v20  ;;  %v769_v6 = vrot.slane %v1024_v62, %v1174_v20  ;;  %v777_v7 = vrot.slane %v770_v63, %v1174_v20  ;;  %v785_v8 = vrot.slane %v1025_v0, %v1174_v20 }
 0x1d6   : > { %670 = vst.msk [vmem:[%s285_s18] sm:$0xf] %vm513_vm2, %v666_v1  ;;  %671 = vst.msk [vmem:[%s285_s18 + $0x4] sm:$0xf] %vm513_vm2, %v667_v2 }
 0x1d7   : > { %672 = vst.msk [vmem:[%s285_s18 + $0x8] sm:$0xf] %vm513_vm2, %v668_v3  ;;  %673 = vst.msk [vmem:[%s285_s18 + $0xc] sm:$0xf] %vm513_vm2, %v669_v4  ;;  %v786_v9 = vcombine.low %v761_v5, %v769_v6  ;;  %v787_v10 = vcombine.high %v761_v5, %v769_v6  ;;  %v802_v11 = vcombine.low %v777_v7, %v785_v8 }
 0x1d8   : > { %v803_v12 = vcombine.high %v777_v7, %v785_v8 }
 0x1d9   : > { %v794_v13 = vrot.slane %v786_v9, %v1176_v26  ;;  %v801_v14 = vrot.slane %v787_v10, %v1176_v26  ;;  %v810_v15 = vrot.slane %v802_v11, %v1176_v26 }
 0x1da   : > { %v817_v20 = vrot.slane %v803_v12, %v1176_v26 }
 0x1db   : > { %v818_v16 = vcombine.low %v794_v13, %v810_v15  ;;  %v819_v17 = vcombine.high %v794_v13, %v810_v15 }
 0x1dc   : > { %v820_v18 = vcombine.low %v801_v14, %v817_v20  ;;  %v821_v19 = vcombine.high %v801_v14, %v817_v20 }
 0x1dd   : > { %v822_v21 = vpack.c.bf16 %v818_v16, %v818_v16  ;;  %v823_v22 = vpack.c.bf16 %v819_v17, %v819_v17 }
 0x1de   : > { %v824_v23 = vpack.c.bf16 %v820_v18, %v820_v18  ;;  %v825_v24 = vpack.c.bf16 %v821_v19, %v821_v19 }
 0x1df   : > { %826 = vst.msk [vmem:[%s293_s24] sm:$0xf] %vm513_vm2, %v822_v21  ;;  %827 = vst.msk [vmem:[%s293_s24 + $0x4] sm:$0xf] %vm513_vm2, %v823_v22 }
 0x1e0   : > { %828 = vst.msk [vmem:[%s293_s24 + $0x8] sm:$0xf] %vm513_vm2, %v824_v23  ;;  %829 = vst.msk [vmem:[%s293_s24 + $0xc] sm:$0xf] %vm513_vm2, %v825_v24 }
 0x1e1 PF: > { %s16_s20 = sadd.s32 1, %s1099_s20   ;;  %s1271_s18 = smov %s1095_s19 }
 0x1e2   : > { %p13_p5 = scmp.ge.s32.totalorder %s16_s20, 4   ;;  %s1272_s19 = smov %s1274_s21 }
 0x1e4   :  { %15 = sbr.rel (!%p13_p5) target bundleno = 2 (0x2), region = 86 }

// kernel: masked_mha.7
= control target key start
LH: loop header
LB: loop body
LE: loop exit
PB: predicated region body
PF: predicated region fallthrough
CT: control target
= control target key end

     0   :  { %8 = vsyncpa [#allocation3], 0  ;;  %s1064_s0 = inlined_call_operand.vmem [shape: bf16[2,4,8,8], index: 0, kind: input, shape index: {}]   ;;  %s1065_s1 = inlined_call_operand.vmem [shape: bf16[2,4,8,8], index: 1, kind: input, shape index: {}]   ;;  %s1066_s2 = inlined_call_operand.vmem [shape: f32[2,4,8,1], index: 2, kind: input, shape index: {}]   ;;  %s1067_s3 = inlined_call_operand.hbm [shape: bf16[2,4,8,8], index: 3, kind: output, shape index: {}]  }
   0x1   :  { %10 = vsyncpa [#allocation3 + $0x1], 0  ;;  %s924_s12 = smov 0   ;;  %s926_s13 = smov 0  }
   0x2   :  { %s928_s14 = smov 0   ;;  %s930_s15 = smov 0  }
   0x3   :  { %s932_s16 = smov 0   ;;  %s934_s17 = smov 0  }
   0x4 LB: > { %s693_s18 = sadd.s32 4294967295, %s896_s17   ;;  %s694_s19 = sadd.s32 4294967294, %s896_s17   ;;  %s896_s17 = sphi %s934_s17, %s16_s17   ;;  %s892_s16 = sphi %s932_s16, %s1074_s16   ;;  %s888_s15 = sphi %s930_s15, %s1073_s15   ;;  %s884_s14 = sphi %s928_s14, %s1072_s14   ;;  %s880_s13 = sphi %s926_s13, %s1071_s13   ;;  %s876_s12 = sphi %s924_s12, %s1070_s12  }
   0x5   : > { %s35_s20 = sadd.s32 1, %s892_s16  ;;  %s134_s21 = sadd.s32 1, %s884_s14 }
   0x6   : > { %p37_p0 = scmp.ge.s32.totalorder %s35_s20, 2  ;;  %p144_p1 = scmp.ne.s32.totalorder %s884_s14, %s880_s13 }
   0x7   : > { %p145_p2 = scmp.eq.s32.totalorder %s693_s18, 1  ;;  %p150_p3 = scmp.ne.s32.totalorder %s880_s13, %s876_s12 }
   0x8   : > { %s1076_s20 = smov (%p37_p0, %s35_s20), 0  ;;  %p151_p5 = scmp.eq.s32.totalorder %s694_s19, 1 }
   0x9   : > { %p964_p4 = por %p145_p2, %p144_p1  ;;  %s127_s23 = ssub.s32 %s892_s16, %s1076_s20 }
   0xa   : > { %p697_p6 = scmp.ge.s32.totalorder %s896_s17, 1  ;;  %p132_p7 = scmp.eq.s32.totalorder %s127_s23, 0 }
   0xb   : > { %p971_p8 = por %p151_p5, %p150_p3  ;;  %p206_p9 = scmp.lt.s32.totalorder %s896_s17, 3 }
   0xc   : > { %s977_s25 = scalar_select %p132_p7, %s884_s14, %s134_s21  }
   0xd   : > { %p207_p10 = pnand %p697_p6, %p206_p9 }
   0xe   : > { %p251_p11 = scmp.lt.s32.totalorder (!%p207_p10), %s888_s15, 1  ;;  %s248_s11 = sand.u32 (!%p207_p10), 1, %s880_s13  }
   0xf   : > { %210 = sbr.rel (%p207_p10) target bundleno = 270 (0x10e), region = 32  ;;  %s698_s18 = sshll.u32 (!%p207_p10), %s248_s11, 4 }
  0x10   : > { %s250_s19 = scalar_lea.vmem (!%p207_p10), [#allocation2], %s698_s18  ;;  %s717_s21 = sshll.u32 (!%p207_p10), %s888_s15, 8 }
  0x11   : > { %s575_s23 = sshll.u32 (!%p207_p10), %s250_s19, 4  ;;  %s901_s30 = smov (!%p207_p10), [#allocation2]   ;;  %s1015_s23 = int_to_ptr.vmem [resolvable:$true] %s575_s23 }
  0x12   : > { %s820_s29 = scalar_lea.vmem (!%p207_p10), %s1015_s23, 256 }
  0x13   : > { %p821_p12 = scmp.ne.s32.totalorder (!%p207_p10), %s1015_s23, %s820_s29 }
  0x14   : > { %v898_v0 = vmov 0.0   ;;  %s252_s26 = scalar_select %p251_p11, %s888_s15, 1  ;;  %vm899_vm0 = vmmov 0   ;;  %v900_v1 = vmov 0   ;;  %vm301_vm1 = vcmask 64512  }
  0x15   : > { %726 = vmatprep.subr.bf16.mxu0 %v898_v0  ;;  %732 = vmatprep.subr.bf16.mxu1 %v898_v0  ;;  %v539_v34 = vlaneseq  ;;  %vm554_vm3 = vcmask 60416   ;;  %s1019_s15 = scalar_lea.sflag [#allocation3], %s248_s11  ;;  %p822_p13 = pnand %p821_p12, %p964_p4 }
  0x16   : > { %728 = vmatprep.mubr.msk.bf16.mxu0 %vm899_vm0, %v898_v0  ;;  %734 = vmatprep.mubr.msk.bf16.mxu1 %vm899_vm0, %v898_v0  ;;  %s714_s27 = sshll.u32 %s252_s26, 4  ;;  %s716_s28 = sshll.u32 %s252_s26, 5 }
  0x17   : > { %810 = vset.pattern.permute.xlu0 %v900_v1  ;;  %811 = vset.pattern.permute.xlu1 %v900_v1  ;;  %s268_s4 = scalar_lea.vmem %s1065_s1, %s714_s27  ;;  %s278_s7 = scalar_lea.vmem %s1066_s2, %s716_s28  ;;  %v540_v43 = vshrl.u32 %v539_v34, 7  ;;  %v542_v44 = vand.u32 127, %v539_v34 }
  0x18   : > { %v297_v2 = vld [vmem:[%s268_s4] sm:$0xf]  ;;  %v298_v3 = vld [vmem:[%s268_s4 + $0x4] sm:$0xf]  ;;  %s258_s10 = scalar_lea.vmem %s1064_s0, %s714_s27  ;;  %v488_v7 = vld [vmem:[%s278_s7 + $0x10] sm:$0xff]  ;;  %s1013_s28 = scalar_lea.hbm %s1067_s3, %s717_s21 }
  0x19   : > { %v306_v4 = vsel %vm301_vm1, %v297_v2, 0  ;;  %v352_v5 = vsel %vm301_vm1, %v298_v3, 0  ;;  %v486_v6 = vld [vmem:[%s278_s7] sm:$0xff]  ;;  %v299_v8 = vld [vmem:[%s268_s4 + $0x8] sm:$0xf]  ;;  %502 = vperm.xlu1 %811, %v488_v7   ;;  %v489_v11 = vld [vmem:[%s278_s7 + $0x18] sm:$0xff]  ;;  %vm543_vm2 = vcmp.gt.s32.totalorder %v542_v44, %v540_v43  ;;  %p823_p0 = pneg %p822_p13 }
  0x1a   : > { %727 = vmatpush3.bf16.xpose.msra.mxu0 %v306_v4  ;;  %733 = vmatpush3.bf16.xpose.msra.mxu1 %v352_v5  ;;  %v300_v9 = vld [vmem:[%s268_s4 + $0xc] sm:$0xf]  ;;  %v293_v12 = vld [vmem:[%s258_s10] sm:$0xf]  ;;  %v294_v13 = vld [vmem:[%s258_s10 + $0x4] sm:$0xf] }
  0x1b   : > { %738 = vmatprep.subr.bf16.mxu0 %v898_v0  ;;  %744 = vmatprep.subr.bf16.mxu1 %v898_v0  ;;  %v487_v10 = vld [vmem:[%s278_s7 + $0x8] sm:$0xff]  ;;  %v398_v14 = vsel %vm301_vm1, %v299_v8, 0  ;;  %v444_v15 = vsel %vm301_vm1, %v300_v9, 0  ;;  %s824_s4 = sshll.u32 %s901_s30, 4  ;;  %s825_s4 = int_to_ptr.vmem [resolvable:$false] %s824_s4 }
  0x1c   : > { %492 = vperm.xlu0 %810, %v486_v6   ;;  %v295_v16 = vld [vmem:[%s258_s10 + $0x8] sm:$0xf]  ;;  %v296_v17 = vld [vmem:[%s258_s10 + $0xc] sm:$0xf]  ;;  %s826_s5 = scalar_lea.vmem %s825_s4, 512  ;;  %p827_p1 = scmp.lt.s32.totalorder %s1015_s23, %s825_s4 }
  0x1d   : > { %507 = vperm.xlu1 %811, %v489_v11   ;;  %p828_p2 = scmp.lt.s32.totalorder %s826_s5, %s820_s29 }
  0x1f   : > { %p829_p3 = por %p828_p2, %p827_p1 }
  0x20   : > { %497 = vperm.xlu0 %810, %v487_v10  }
  0x21   : > { %729 = vmatmul.mubr.msk.bf16.vlgmr.msra.gmra.mxu0 %vm301_vm1, %v293_v12  ;;  %735 = vmatmul.mubr.msk.bf16.vlgmr.msra.gmra.mxu1 %vm301_vm1, %v294_v13  ;;  %p830_p5 = pnand %p829_p3, %p823_p0 }
  0x22   : > { %739 = vmatpush3.bf16.xpose.msra.mxu0 %v398_v14  ;;  %745 = vmatpush3.bf16.xpose.msra.mxu1 %v444_v15 }
  0x23   : > { %740 = vmatprep.mubr.msk.bf16.mxu0 %vm899_vm0, %v898_v0  ;;  %746 = vmatprep.mubr.msk.bf16.mxu1 %vm899_vm0, %v898_v0 }
  0x29   : > { %741 = vmatmul.mubr.msk.bf16.vlgmr.msra.gmra.mxu0 %vm301_vm1, %v295_v16  ;;  %747 = vmatmul.mubr.msk.bf16.vlgmr.msra.gmra.mxu1 %vm301_vm1, %v296_v17 }
  0x94   : > { %v503_v23 = vpop.permute.xlu1 %502 }
  0x97   : > { %v493_v18 = vpop.permute.xlu0 %492 }
  0x98   : > { %v508_v33 = vpop.permute.xlu1 %507 }
  0x9b   : > { %v498_v19 = vpop.permute.xlu0 %497 }
  0xe1   : > { %v342_v20 = vpop.f32.mrf.mxu0  ;;  %v388_v21 = vpop.f32.mrf.mxu1 }
  0xe2   : > { %v510_v22 = vsub.f32 %v342_v20, %v493_v18  ;;  %v511_v24 = vsub.f32 %v388_v21, %v498_v19 }
  0xe3   : > { %v730_v25 = vpop.f32.mrf.mxu0  ;;  %v736_v26 = vpop.f32.mrf.mxu1 }
  0xe4   : > { %v514_v27 = vmul.f32 1.442695, %v510_v22  ;;  %v516_v28 = vmul.f32 1.442695, %v511_v24 }
  0xe5   : > { %v345_v29 = vpop.f32.mrf.mxu0  ;;  %v391_v30 = vpop.f32.mrf.mxu1 }
  0xe6   : > { %812 = vpow2.f32 %v514_v27 }
  0xe7   : > { %814 = vpow2.f32 %v516_v28  ;;  %v731_v31 = vpop.f32.mrf.mxu0  ;;  %v737_v32 = vpop.f32.mrf.mxu1 }
  0xe9   : > { %v434_v35 = vpop.f32.mrf.mxu0  ;;  %v480_v36 = vpop.f32.mrf.mxu1 }
  0xea   : > { %v512_v37 = vsub.f32 %v434_v35, %v503_v23  ;;  %v513_v38 = vsub.f32 %v480_v36, %v508_v33 }
  0xeb   : > { %v742_v39 = vpop.f32.mrf.mxu0  ;;  %v748_v40 = vpop.f32.mrf.mxu1 }
  0xec   : > { %v518_v41 = vmul.f32 1.442695, %v512_v37  ;;  %v520_v42 = vmul.f32 1.442695, %v513_v38 }
  0xed   : > { %v437_v45 = vpop.f32.mrf.mxu0  ;;  %v483_v46 = vpop.f32.mrf.mxu1 }
  0xee   : > { %816 = vpow2.f32 %v518_v41 }
  0xef   : > { %818 = vpow2.f32 %v520_v42  ;;  %v743_v47 = vpop.f32.mrf.mxu0  ;;  %v749_v48 = vpop.f32.mrf.mxu1 }
  0xf3   : > { %v813_v49 = vpop.eup %812 }
  0xf4   : > { %v815_v50 = vpop.eup %814  ;;  %v546_v51 = vsel %vm543_vm2, 0.0, %v813_v49 }
  0xf5   : > { %v550_v52 = vpack.c.bf16 %v546_v51, %v546_v51  ;;  %v547_v53 = vsel %vm543_vm2, 0.0, %v815_v50 }
  0xf6   : > { %v551_v54 = vpack.c.bf16 %v547_v53, %v547_v53 }
  0xf7   : > { %555 = vst.msk [vmem:[%s250_s19] sm:$0xf] %vm554_vm3, %v550_v52 }
  0xf8   : > { %556 = vst.msk [vmem:[%s250_s19 + $0x4] sm:$0xf] %vm554_vm3, %v551_v54 }
  0xfb   : > { %v817_v55 = vpop.eup %816 }
  0xfc   : > { %v819_v56 = vpop.eup %818  ;;  %v548_v57 = vsel %vm543_vm2, 0.0, %v817_v55 }
  0xfd   : > { %v552_v58 = vpack.c.bf16 %v548_v57, %v548_v57  ;;  %v549_v59 = vsel %vm543_vm2, 0.0, %v819_v56 }
  0xfe   : > { %v553_v60 = vpack.c.bf16 %v549_v59, %v549_v59 }
  0xff   : > { %557 = vst.msk [vmem:[%s250_s19 + $0x8] sm:$0xf] %vm554_vm3, %v552_v58 }
 0x100   : > { %558 = vst.msk [vmem:[%s250_s19 + $0xc] sm:$0xf] %vm554_vm3, %v553_v60 }
 0x101   : > { %833 = shalt.err (!%p830_p5)
}
 0x102   : > { %s834_s6 = scalar_lea.hbm %s1013_s28, 256  ;;  %s838_s9 = scalar_lea.hbm %s1067_s3, 512 }
 0x103   : > { %p835_p6 = scmp.ne.s32.totalorder %s1013_s28, %s834_s6  ;;  %p839_p10 = scmp.lt.s32.totalorder %s1013_s28, %s1067_s3 }
 0x104   : > { %p840_p11 = scmp.lt.s32.totalorder %s838_s9, %s834_s6 }
 0x105   : > { %p836_p7 = pnand %p835_p6, %p964_p4 }
 0x106   : > { %p841_p12 = por %p840_p11, %p839_p10 }
 0x107   : > { %p837_p9 = pneg %p836_p7 }
 0x109   : > { %p842_p13 = pnand %p841_p12, %p837_p9 }
 0x10b   : > { %845 = shalt.err (!%p842_p13)
}
 0x10c   : > { %s902_s18 = smov 64   ;;  %s903_s19 = smov 4  }
 0x10d   : > { %750 = dma.vmem_to_hbm [thread:$0]  (%p964_p4), %s1015_s23, 256, %s1013_s28, %s1019_s15, %s902_s18, %s902_s18, %s903_s19  }
 0x10e PF: > { %p756_p0 = scmp.ge.s32.totalorder %s896_s17, 2  ;;  %s590_s21 = sand.u32 1, %s876_s12  }
 0x10f   : > { %s591_s26 = scalar_lea.sflag [#allocation3], %s590_s21 }
 0x110   : > { %p753_p1 = pnand %p756_p0, %p971_p8 }
 0x112   : > { %p754_p2 = pneg %p753_p1 }
 0x114   : > { %871 = dma.done.wait (%p754_p2), %s591_s26, 256  }
 0x115   : > { %873 = vsyncadd (%p754_p2), %s591_s26, 4294967040  ;;  %s16_s17 = sadd.s32 1, %s896_s17   ;;  %s1070_s12 = smov %s880_s13 }
 0x116   : > { %p13_p3 = scmp.ge.s32.totalorder %s16_s17, 4   ;;  %s1071_s13 = smov %s884_s14 }
 0x117   : > { %s1072_s14 = smov %s977_s25  ;;  %s1073_s15 = smov %s892_s16 }
 0x118   : > { %s1074_s16 = smov %s1076_s20  ;;  %15 = sbr.rel (!%p13_p3) target bundleno = 4 (0x4), region = 89 }
 0x11d   :  { %596 = vsyncpa [#allocation3], 1 }
 0x11e   :  { %598 = vsyncpa [#allocation3 + $0x1], 1 }

// kernel: masked_mha.5
= control target key start
LH: loop header
LB: loop body
LE: loop exit
PB: predicated region body
PF: predicated region fallthrough
CT: control target
= control target key end

     0   :  { %s1836_s15 = smov 0   ;;  %s1838_s16 = smov 0   ;;  %s2040_s0 = inlined_call_operand.vmem [shape: bf16[2,4,8,8], index: 0, kind: input, shape index: {}]   ;;  %s2041_s1 = inlined_call_operand.vmem [shape: bf16[2,4,8,8], index: 1, kind: input, shape index: {}]   ;;  %s2042_s2 = inlined_call_operand.vmem [shape: bf16[2,4,8,8], index: 2, kind: input, shape index: {}]   ;;  %s2043_s3 = inlined_call_operand.vmem [shape: bf16[2,8,32], index: 3, kind: output, shape index: {0}]   ;;  %s2044_s4 = inlined_call_operand.vmem [shape: f32[2,4,8,1], index: 4, kind: output, shape index: {1}]  }
   0x1   :  { %s1840_s17 = smov 0  }
   0x2 LB: > { %s34_s18 = sadd.s32 1, %s1796_s16  ;;  %p1617_p0 = scmp.ge.s32.totalorder %s1800_s17, 1  ;;  %s1800_s17 = sphi %s1840_s17, %s15_s17   ;;  %s1796_s16 = sphi %s1838_s16, %s2046_s16   ;;  %s1792_s15 = sphi %s1836_s15, %s2045_s15  }
   0x3   : > { %p36_p1 = scmp.ge.s32.totalorder %s34_s18, 2  ;;  %p239_p2 = scmp.lt.s32.totalorder %s1800_s17, 3 }
   0x5   : > { %s2048_s18 = smov (%p36_p1, %s34_s18), 0  ;;  %p240_p3 = pnand %p1617_p0, %p239_p2 }
   0x6   : > { %p298_p4 = scmp.lt.s32.totalorder (!%p240_p3), %s1792_s15, 1  ;;  %s1808_s7 = smov (!%p240_p3), 16  }
   0x7   : > { %243 = sbr.rel (%p240_p3) target bundleno = 944 (0x3b0), region = 32  ;;  %s1809_s8 = smov (!%p240_p3), 8  }
   0x8   : > { %s1810_s9 = smov (!%p240_p3), 24  }
   0xc   : > { %vm359_vm0 = vcmask 64512   ;;  %v1802_v0 = vmov 0.0   ;;  %s2050_s15 = smov (!%p298_p4, %s1792_s15), 1  ;;  %vm1803_vm1 = vmmov 0   ;;  %vm350_vm2 = vcmask 7168  }
   0xd   : > { %1663 = vmatprep.subr.bf16.mxu0 %v1802_v0  ;;  %1669 = vmatprep.subr.bf16.mxu1 %v1802_v0  ;;  %360 = vst.msk [vmem:[#allocation4] sm:$0xff] %vm359_vm0, %v1802_v0  ;;  %361 = vst.msk [vmem:[#allocation4 + $0x8] sm:$0xff] %vm359_vm0, %v1802_v0  ;;  %s1871_s19 = sshll.u32 %s2050_s15, 4  ;;  %v1804_v13 = vmov -1e+30   ;;  %v895_v14 = vlaneseq  ;;  %v1805_v41 = vmov 0  }
   0xe   : > { %362 = vst.msk [vmem:[#allocation4 + $0x10] sm:$0xff] %vm359_vm0, %v1802_v0  ;;  %363 = vst.msk [vmem:[#allocation4 + $0x18] sm:$0xff] %vm359_vm0, %v1802_v0  ;;  %1665 = vmatprep.mubr.msk.bf16.mxu0 %vm1803_vm1, %v1802_v0  ;;  %1671 = vmatprep.mubr.msk.bf16.mxu1 %vm1803_vm1, %v1802_v0  ;;  %s315_s22 = scalar_lea.vmem %s2041_s1, %s1871_s19  ;;  %s305_s25 = scalar_lea.vmem %s2040_s0, %s1871_s19  ;;  %vm1034_vm4 = vcmask 1043456   ;;  %vm1418_vm5 = vcmask 130048   ;;  %vm1420_vm6 = vcmask 195584   ;;  %vm1423_vm7 = vcmask 257024  }
   0xf   : > { %v372_v1 = vld [vmem:[%s315_s22] sm:$0xf]  ;;  %v373_v2 = vld [vmem:[%s315_s22 + $0x4] sm:$0xf]  ;;  %v374_v5 = vld [vmem:[%s315_s22 + $0x8] sm:$0xf]  ;;  %1744 = vset.pattern.permute.xlu0 %v1805_v41  ;;  %1745 = vset.pattern.permute.xlu1 %v1805_v41  ;;  %s327_s28 = scalar_lea.vmem %s2042_s2, %s1871_s19 }
  0x10   : > { %v385_v3 = vsel %vm359_vm0, %v372_v1, 0  ;;  %v431_v4 = vsel %vm359_vm0, %v373_v2, 0  ;;  %v375_v6 = vld [vmem:[%s315_s22 + $0xc] sm:$0xf]  ;;  %v368_v7 = vld [vmem:[%s305_s25] sm:$0xf] }
  0x11   : > { %1664 = vmatpush3.bf16.xpose.msra.mxu0 %v385_v3  ;;  %1670 = vmatpush3.bf16.xpose.msra.mxu1 %v431_v4  ;;  %v369_v8 = vld [vmem:[%s305_s25 + $0x4] sm:$0xf]  ;;  %v477_v9 = vsel %vm359_vm0, %v374_v5, 0  ;;  %v523_v10 = vsel %vm359_vm0, %v375_v6, 0  ;;  %v370_v11 = vld [vmem:[%s305_s25 + $0x8] sm:$0xf] }
  0x12   : > { %1675 = vmatprep.subr.bf16.mxu0 %v1802_v0  ;;  %1681 = vmatprep.subr.bf16.mxu1 %v1802_v0  ;;  %v371_v12 = vld [vmem:[%s305_s25 + $0xc] sm:$0xf]  ;;  %351 = vst.msk [vmem:[#allocation2] sm:$0xff] %vm350_vm2, %v1804_v13  ;;  %352 = vst.msk [vmem:[#allocation2 + $0x8] sm:$0xff] %vm350_vm2, %v1804_v13  ;;  %v1913_v15 = vshrl.u32 %v895_v14, 7  ;;  %v898_v16 = vand.u32 127, %v895_v14 }
  0x13   : > { %353 = vst.msk [vmem:[#allocation2 + $0x10] sm:$0xff] %vm350_vm2, %v1804_v13  ;;  %354 = vst.msk [vmem:[#allocation2 + $0x18] sm:$0xff] %vm350_vm2, %v1804_v13  ;;  %v376_v57 = vld [vmem:[%s327_s28] sm:$0xf]  ;;  %v377_v60 = vld [vmem:[%s327_s28 + $0x4] sm:$0xf] }
  0x14   : > { %355 = vst.msk [vmem:[#allocation3] sm:$0xff] %vm350_vm2, %v1802_v0  ;;  %356 = vst.msk [vmem:[#allocation3 + $0x8] sm:$0xff] %vm350_vm2, %v1802_v0  ;;  %vm899_vm3 = vcmp.gt.s32.totalorder %v898_v16, %v1913_v15  ;;  %v1036_v59 = vsel %vm1034_vm4, %v376_v57, 0  ;;  %v1082_v61 = vsel %vm1034_vm4, %v377_v60, 0  ;;  %v378_v62 = vld [vmem:[%s327_s28 + $0x8] sm:$0xf] }
  0x15   : > { %357 = vst.msk [vmem:[#allocation3 + $0x10] sm:$0xff] %vm350_vm2, %v1802_v0  ;;  %358 = vst.msk [vmem:[#allocation3 + $0x18] sm:$0xff] %vm350_vm2, %v1802_v0  ;;  %v1128_v63 = vsel %vm1034_vm4, %v378_v62, 0  ;;  %v379_v1 = vld [vmem:[%s327_s28 + $0xc] sm:$0xf]  ;;  %s1646_s29 = sshll.u32 %s2050_s15, 5 }
  0x16   : > { %v1174_v2 = vsel %vm1034_vm4, %v379_v1, 0  ;;  %s344_s6 = scalar_lea.vmem %s2044_s4, %s1646_s29  ;;  %s1624_s10 = sshll.u32 %s2050_s15, 2 }
  0x17   : > { %s336_s13 = scalar_lea.vmem %s2043_s3, %s1624_s10 }
  0x18   : > { %1666 = vmatmul.mubr.msk.bf16.vlgmr.msra.gmra.mxu0 %vm359_vm0, %v368_v7  ;;  %1672 = vmatmul.mubr.msk.bf16.vlgmr.msra.gmra.mxu1 %vm359_vm0, %v369_v8 }
  0x19   : > { %1676 = vmatpush3.bf16.xpose.msra.mxu0 %v477_v9  ;;  %1682 = vmatpush3.bf16.xpose.msra.mxu1 %v523_v10  ;;  %v1940_v42 = vld [vmem:[#allocation2] sm:$0xff]  ;;  %v1945_v45 = vld [vmem:[#allocation2 + $0x8] sm:$0xff] }
  0x1a   : > { %1677 = vmatprep.mubr.msk.bf16.mxu0 %vm1803_vm1, %v1802_v0  ;;  %1683 = vmatprep.mubr.msk.bf16.mxu1 %vm1803_vm1, %v1802_v0  ;;  %v1955_v49 = vld [vmem:[#allocation2 + $0x10] sm:$0xff]  ;;  %v1965_v53 = vld [vmem:[#allocation2 + $0x18] sm:$0xff] }
  0x1b   : > { %1687 = vmatprep.subr.bf16.mxu0 %v1802_v0  ;;  %1693 = vmatprep.subr.bf16.mxu1 %v1802_v0 }
  0x20   : > { %1678 = vmatmul.mubr.msk.bf16.vlgmr.msra.gmra.mxu0 %vm359_vm0, %v370_v11  ;;  %1684 = vmatmul.mubr.msk.bf16.vlgmr.msra.gmra.mxu1 %vm359_vm0, %v371_v12 }
  0x21   : > { %1689 = vmatprep.mubr.msk.bf16.mxu0 %vm1803_vm1, %v1802_v0  ;;  %1695 = vmatprep.mubr.msk.bf16.mxu1 %vm1803_vm1, %v1802_v0 }
  0x22   : > { %1688 = vmatpush3.bf16.msra.mxu0 %v1036_v59  ;;  %1694 = vmatpush3.bf16.msra.mxu1 %v1082_v61 }
  0x23   : > { %1699 = vmatprep.subr.bf16.mxu0 %v1802_v0  ;;  %1705 = vmatprep.subr.bf16.mxu1 %v1802_v0 }
  0xd8   : > { %v421_v17 = vpop.f32.mrf.mxu0  ;;  %v467_v18 = vpop.f32.mrf.mxu1 }
  0xd9   : > { %v1918_v19 = vsel %vm899_vm3, -1e+30, %v421_v17  ;;  %v1922_v20 = vsel %vm899_vm3, -1e+30, %v467_v18 }
  0xda   : > { %v1667_v21 = vpop.f32.mrf.mxu0  ;;  %v1673_v22 = vpop.f32.mrf.mxu1  ;;  %v910_v23 = vsel %vm359_vm0, %v1918_v19, -inf  ;;  %v913_v26 = vsel %vm359_vm0, %v1922_v20, -inf }
  0xdb   : > { %911 = vmax.xlane.f32.xlu0 %v910_v23 }
  0xdc   : > { %v424_v24 = vpop.f32.mrf.mxu0  ;;  %v470_v25 = vpop.f32.mrf.mxu1 }
  0xde   : > { %v1668_v27 = vpop.f32.mrf.mxu0  ;;  %v1674_v28 = vpop.f32.mrf.mxu1 }
  0xdf   : > { %914 = vmax.xlane.f32.xlu0 %v913_v26 }
  0xe0   : > { %v513_v29 = vpop.f32.mrf.mxu0  ;;  %v559_v30 = vpop.f32.mrf.mxu1 }
  0xe1   : > { %v1930_v31 = vsel %vm899_vm3, -1e+30, %v513_v29  ;;  %v1934_v32 = vsel %vm899_vm3, -1e+30, %v559_v30 }
  0xe2   : > { %v1679_v33 = vpop.f32.mrf.mxu0  ;;  %v1685_v34 = vpop.f32.mrf.mxu1  ;;  %v916_v35 = vsel %vm359_vm0, %v1930_v31, -inf  ;;  %v919_v38 = vsel %vm359_vm0, %v1934_v32, -inf }
  0xe3   : > { %917 = vmax.xlane.f32.xlu1 %v916_v35  ;;  %v970_v35 = vld [vmem:[#allocation3] sm:$0xff] }
  0xe4   : > { %v516_v36 = vpop.f32.mrf.mxu0  ;;  %v562_v37 = vpop.f32.mrf.mxu1 }
  0xe6   : > { %v1680_v39 = vpop.f32.mrf.mxu0  ;;  %v1686_v40 = vpop.f32.mrf.mxu1 }
  0xe7   : > { %920 = vmax.xlane.f32.xlu1 %v919_v38  ;;  %v971_v38 = vld [vmem:[#allocation3 + $0x8] sm:$0xff] }
 0x164   : > { %v912_v43 = vpop.xlane.xlu0 %911 }
 0x165   : > { %v1943_v44 = vmax.f32 %v1940_v42, %v912_v43 }
 0x167   : > { %v926_v46 = vsub.f32 %v1940_v42, %v1943_v44  ;;  %1224 = vst.msk [vmem:[#allocation2] sm:$0xff] %vm350_vm2, %v1943_v44  ;;  %940 = vperm.xlu0 %1744, %v1943_v44   ;;  %v972_v42 = vld [vmem:[#allocation3 + $0x10] sm:$0xff] }
 0x168   : > { %v915_v47 = vpop.xlane.xlu0 %914 }
 0x169   : > { %v1953_v48 = vmax.f32 %v1945_v45, %v915_v47  ;;  %v930_v27 = vmul.f32 1.442695, %v926_v46  ;;  %v973_v46 = vld [vmem:[#allocation3 + $0x18] sm:$0xff] }
 0x16b   : > { %v927_v50 = vsub.f32 %v1945_v45, %v1953_v48  ;;  %1225 = vst.msk [vmem:[#allocation2 + $0x8] sm:$0xff] %vm350_vm2, %v1953_v48  ;;  %945 = vperm.xlu1 %1745, %v1953_v48  }
 0x16c   : > { %v918_v51 = vpop.xlane.xlu1 %917 }
 0x16d   : > { %v1963_v52 = vmax.f32 %v1955_v49, %v918_v51  ;;  %v932_v25 = vmul.f32 1.442695, %v927_v50 }
 0x16f   : > { %v928_v54 = vsub.f32 %v1955_v49, %v1963_v52  ;;  %1226 = vst.msk [vmem:[#allocation2 + $0x10] sm:$0xff] %vm350_vm2, %v1963_v52  ;;  %950 = vperm.xlu1 %1745, %v1963_v52  }
 0x170   : > { %v921_v55 = vpop.xlane.xlu1 %920 }
 0x171   : > { %v1973_v56 = vmax.f32 %v1965_v53, %v921_v55 }
 0x173   : > { %v929_v58 = vsub.f32 %v1965_v53, %v1973_v56  ;;  %1227 = vst.msk [vmem:[#allocation2 + $0x18] sm:$0xff] %vm350_vm2, %v1973_v56  ;;  %955 = vperm.xlu1 %1745, %v1973_v56  }
 0x175   : > { %v936_v30 = vmul.f32 1.442695, %v929_v58  ;;  %v1425_v58 = vld [vmem:[#allocation2] sm:$0xff] }
 0x1e2   : > { %v941_v3 = vpop.permute.xlu0 %940 }
 0x1e3   : > { %v958_v4 = vsub.f32 %v1918_v19, %v941_v3 }
 0x1e5   : > { %v962_v5 = vmul.f32 1.442695, %v958_v4 }
 0x1e6   : > { %v946_v6 = vpop.permute.xlu1 %945 }
 0x1e7   : > { %1746 = vpow2.f32 %v962_v5  ;;  %v959_v7 = vsub.f32 %v1922_v20, %v946_v6  ;;  %v1427_v5 = vld [vmem:[#allocation2 + $0x10] sm:$0xff] }
 0x1e9   : > { %v964_v8 = vmul.f32 1.442695, %v959_v7 }
 0x1ea   : > { %v951_v9 = vpop.permute.xlu1 %950 }
 0x1eb   : > { %1748 = vpow2.f32 %v964_v8  ;;  %v960_v10 = vsub.f32 %v1930_v31, %v951_v9 }
 0x1ed   : > { %v966_v11 = vmul.f32 1.442695, %v960_v10  ;;  %v1428_v10 = vld [vmem:[#allocation2 + $0x18] sm:$0xff] }
 0x1ee   : > { %v956_v12 = vpop.permute.xlu1 %955 }
 0x1ef   : > { %1750 = vpow2.f32 %v966_v11  ;;  %v961_v13 = vsub.f32 %v1934_v32, %v956_v12 }
 0x1f1   : > { %v968_v14 = vmul.f32 1.442695, %v961_v13  ;;  %v999_v13 = vld [vmem:[#allocation4] sm:$0xff] }
 0x1f3   : > { %1752 = vpow2.f32 %v968_v14 }
 0x1f4   : > { %v1747_v16 = vpop.eup %1746  ;;  %1754 = vpow2.f32 %v932_v25 }
 0x1f5   : > { %v978_v17 = vsel %vm359_vm0, %v1747_v16, 0.0  ;;  %v1027_v18 = vpack.c.bf16 %v1747_v16, %v1747_v16  ;;  %1756 = vpow2.f32 %v930_v27  ;;  %v1000_v16 = vld [vmem:[#allocation4 + $0x8] sm:$0xff] }
 0x1f6   : > { %979 = vadd.xlane.f32.xlu1 %v978_v17 }
 0x1f7   : > { %1690 = vmatmul.mubr.msk.bf16.vlgmr.msra.gmra.mxu0 %vm359_vm0, %v1027_v18 }
 0x1f8   : > { %v1749_v19 = vpop.eup %1748  ;;  %1700 = vmatpush3.bf16.msra.mxu0 %v1128_v63  ;;  %1701 = vmatprep.mubr.msk.bf16.mxu0 %vm1803_vm1, %v1802_v0  ;;  %v1426_v63 = vld [vmem:[#allocation2 + $0x8] sm:$0xff] }
 0x1f9   : > { %v981_v20 = vsel %vm359_vm0, %v1749_v19, 0.0  ;;  %v1028_v21 = vpack.c.bf16 %v1749_v19, %v1749_v19 }
 0x1fa   : > { %982 = vadd.xlane.f32.xlu0 %v981_v20 }
 0x1fb   : > { %1696 = vmatmul.mubr.msk.bf16.vlgmr.msra.gmra.mxu1 %vm359_vm0, %v1028_v21 }
 0x1fc   : > { %v1751_v22 = vpop.eup %1750  ;;  %1706 = vmatpush3.bf16.msra.mxu1 %v1174_v2  ;;  %1707 = vmatprep.mubr.msk.bf16.mxu1 %vm1803_vm1, %v1802_v0  ;;  %v934_v0 = vmul.f32 1.442695, %v928_v54 }
 0x1fd   : > { %v984_v23 = vsel %vm359_vm0, %v1751_v22, 0.0  ;;  %v1029_v24 = vpack.c.bf16 %v1751_v22, %v1751_v22 }
 0x1fe   : > { %985 = vadd.xlane.f32.xlu1 %v984_v23  ;;  %1758 = vpow2.f32 %v934_v0  ;;  %v1001_v23 = vld [vmem:[#allocation4 + $0x10] sm:$0xff] }
 0x1ff   : > { %1702 = vmatmul.mubr.msk.bf16.vlgmr.msra.gmra.mxu0 %vm359_vm0, %v1029_v24  ;;  %1760 = vpow2.f32 %v936_v30  ;;  %v1002_v30 = vld [vmem:[#allocation4 + $0x18] sm:$0xff] }
 0x200   : > { %v1753_v26 = vpop.eup %1752 }
 0x201   : > { %v987_v28 = vsel %vm359_vm0, %v1753_v26, 0.0  ;;  %v1030_v29 = vpack.c.bf16 %v1753_v26, %v1753_v26  ;;  %v1755_v31 = vpop.eup %1754 }
 0x202   : > { %988 = vadd.xlane.f32.xlu1 %v987_v28  ;;  %v1757_v32 = vpop.eup %1756  ;;  %v975_v40 = vmul.f32 %v1755_v31, %v971_v38 }
 0x203   : > { %1708 = vmatmul.mubr.msk.bf16.vlgmr.msra.gmra.mxu1 %vm359_vm0, %v1030_v29  ;;  %v974_v36 = vmul.f32 %v1757_v32, %v970_v35 }
 0x20b   : > { %v1759_v33 = vpop.eup %1758 }
 0x20c   : > { %v1761_v34 = vpop.eup %1760  ;;  %v976_v44 = vmul.f32 %v1759_v33, %v972_v42 }
 0x20d   : > { %v977_v49 = vmul.f32 %v1761_v34, %v973_v46 }
 0x210   : > { %1010 = vperm.xlu0 %1744, %v1755_v31  }
 0x213   : > { %1005 = vperm.xlu1 %1745, %v1757_v32  }
 0x217   : > { %1015 = vperm.xlu1 %1745, %v1759_v33  }
 0x21b   : > { %1020 = vperm.xlu1 %1745, %v1761_v34  }
 0x27f   : > { %v980_v37 = vpop.xlane.xlu1 %979 }
 0x280   : > { %v990_v39 = vadd.f32 %v980_v37, %v974_v36 }
 0x282   : > { %995 = vst.msk [vmem:[#allocation3] sm:$0xff] %vm350_vm2, %v990_v39 }
 0x283   : > { %v983_v41 = vpop.xlane.xlu0 %982 }
 0x284   : > { %v991_v43 = vadd.f32 %v983_v41, %v975_v40 }
 0x286   : > { %996 = vst.msk [vmem:[#allocation3 + $0x8] sm:$0xff] %vm350_vm2, %v991_v43 }
 0x287   : > { %v986_v45 = vpop.xlane.xlu1 %985 }
 0x288   : > { %v992_v47 = vadd.f32 %v986_v45, %v976_v44  ;;  %v1806_v44 = vmov 1983009808  }
 0x289   : > { %v1429_v48 = vld [vmem:[#allocation3] sm:$0xff]  ;;  %v1271_v45 = vunpack.c.l.s4 %v1806_v44 }
 0x28a   : > { %1762 = vlog2.f32 %v1429_v48  ;;  %997 = vst.msk [vmem:[#allocation3 + $0x10] sm:$0xff] %vm350_vm2, %v992_v47 }
 0x28b   : > { %v989_v50 = vpop.xlane.xlu1 %988  ;;  %1764 = vrcp.f32 %v1429_v48  ;;  %v1011_v17 = vpop.permute.xlu0 %1010  ;;  %v1272_v47 = vunpack.c.0.s8 %v1271_v45  ;;  %v1807_v48 = vmov 1934713408  }
 0x28c   : > { %v993_v51 = vadd.f32 %v989_v50, %v977_v49  ;;  %v1024_v22 = vmul.f32 %v1011_v17, %v1000_v16  ;;  %v1303_v49 = vunpack.c.l.s4 %v1807_v48 }
 0x28d   : > { %v1430_v52 = vld [vmem:[#allocation3 + $0x8] sm:$0xff] }
 0x28e   : > { %1766 = vlog2.f32 %v1430_v52  ;;  %998 = vst.msk [vmem:[#allocation3 + $0x18] sm:$0xff] %vm350_vm2, %v993_v51 }
 0x28f   : > { %1768 = vrcp.f32 %v1430_v52  ;;  %v1006_v12 = vpop.permute.xlu1 %1005 }
 0x290   : > { %v1023_v14 = vmul.f32 %v1006_v12, %v999_v13 }
 0x291   : > { %v1431_v53 = vld [vmem:[#allocation3 + $0x10] sm:$0xff] }
 0x292   : > { %1770 = vlog2.f32 %v1431_v53 }
 0x293   : > { %1772 = vrcp.f32 %v1431_v53  ;;  %v1016_v19 = vpop.permute.xlu1 %1015 }
 0x294   : > { %v1025_v29 = vmul.f32 %v1016_v19, %v1001_v23 }
 0x295   : > { %v1432_v54 = vld [vmem:[#allocation3 + $0x18] sm:$0xff] }
 0x296   : > { %1774 = vlog2.f32 %v1432_v54 }
 0x297   : > { %v1763_v55 = vpop.eup %1762  ;;  %1776 = vrcp.f32 %v1432_v54  ;;  %v1021_v0 = vpop.permute.xlu1 %1020 }
 0x298   : > { %v1765_v56 = vpop.eup %1764  ;;  %v1434_v57 = vmul.f32 0.6931472, %v1763_v55  ;;  %v1026_v36 = vmul.f32 %v1021_v0, %v1002_v30 }
 0x299   : > { %1246 = vperm.xlu1 %1745, %v1765_v56   ;;  %v1275_v56 = vsub.s32 %v1272_v47, %v1913_v15 }
 0x29a   : > { %v1441_v59 = vadd.f32 %v1434_v57, %v1425_v58  ;;  %v1304_v57 = vunpack.c.0.s8 %v1303_v49 }
 0x29b   : > { %v1767_v60 = vpop.eup %1766 }
 0x29c   : > { %v1769_v61 = vpop.eup %1768  ;;  %1446 = vst.msk [vmem:[%s344_s6] sm:$0xff] %vm350_vm2, %v1441_v59  ;;  %v1436_v62 = vmul.f32 0.6931472, %v1767_v60 }
 0x29d   : > { %1251 = vperm.xlu0 %1744, %v1769_v61  }
 0x29e   : > { %v1442_v1 = vadd.f32 %v1436_v62, %v1426_v63 }
 0x29f   : > { %v1771_v2 = vpop.eup %1770 }
 0x2a0   : > { %v1773_v3 = vpop.eup %1772  ;;  %1447 = vst.msk [vmem:[%s344_s6 + $0x8] sm:$0xff] %vm350_vm2, %v1442_v1  ;;  %v1438_v4 = vmul.f32 0.6931472, %v1771_v2 }
 0x2a1   : > { %1256 = vperm.xlu1 %1745, %v1773_v3  }
 0x2a2   : > { %v1443_v6 = vadd.f32 %v1438_v4, %v1427_v5  ;;  %v1307_v4 = vsub.s32 %v1304_v57, %v1913_v15 }
 0x2a3   : > { %v1775_v7 = vpop.eup %1774 }
 0x2a4   : > { %v1777_v8 = vpop.eup %1776  ;;  %1448 = vst.msk [vmem:[%s344_s6 + $0x10] sm:$0xff] %vm350_vm2, %v1443_v6  ;;  %v1440_v9 = vmul.f32 0.6931472, %v1775_v7 }
 0x2a5   : > { %1261 = vperm.xlu0 %1744, %v1777_v8  }
 0x2a6   : > { %v1444_v11 = vadd.f32 %v1440_v9, %v1428_v10 }
 0x2a8   : > { %1449 = vst.msk [vmem:[%s344_s6 + $0x18] sm:$0xff] %vm350_vm2, %v1444_v11 }
 0x2b7   : > { %v1072_v18 = vpop.f32.mrf.mxu0 }
 0x2b8   : > { %v1216_v20 = vadd.f32 %v1072_v18, %v1023_v14 }
 0x2b9   : > { %v1691_v21 = vpop.f32.mrf.mxu0 }
 0x2ba   : > { %1220 = vst.msk [vmem:[#allocation4] sm:$0xff] %vm359_vm0, %v1216_v20 }
 0x2bb   : > { %v1075_v24 = vpop.f32.mrf.mxu0  ;;  %v1118_v25 = vpop.f32.mrf.mxu1 }
 0x2bc   : > { %v1217_v26 = vadd.f32 %v1118_v25, %v1024_v22 }
 0x2bd   : > { %v1692_v27 = vpop.f32.mrf.mxu0  ;;  %v1697_v28 = vpop.f32.mrf.mxu1 }
 0x2be   : > { %1221 = vst.msk [vmem:[#allocation4 + $0x8] sm:$0xff] %vm359_vm0, %v1217_v26 }
 0x2bf   : > { %v1121_v31 = vpop.f32.mrf.mxu1  ;;  %v1164_v32 = vpop.f32.mrf.mxu0 }
 0x2c0   : > { %v1218_v33 = vadd.f32 %v1164_v32, %v1025_v29 }
 0x2c1   : > { %v1698_v34 = vpop.f32.mrf.mxu1  ;;  %v1703_v35 = vpop.f32.mrf.mxu0  ;;  %v1240_v54 = vld [vmem:[#allocation4] sm:$0xff] }
 0x2c2   : > { %1222 = vst.msk [vmem:[#allocation4 + $0x10] sm:$0xff] %vm359_vm0, %v1218_v33 }
 0x2c3   : > { %v1167_v37 = vpop.f32.mrf.mxu0  ;;  %v1210_v38 = vpop.f32.mrf.mxu1 }
 0x2c4   : > { %v1219_v39 = vadd.f32 %v1210_v38, %v1026_v36 }
 0x2c5   : > { %v1704_v40 = vpop.f32.mrf.mxu0  ;;  %v1709_v41 = vpop.f32.mrf.mxu1  ;;  %v1241_v58 = vld [vmem:[#allocation4 + $0x8] sm:$0xff] }
 0x2c6   : > { %1223 = vst.msk [vmem:[#allocation4 + $0x18] sm:$0xff] %vm359_vm0, %v1219_v39 }
 0x2c7   : > { %v1213_v42 = vpop.f32.mrf.mxu1 }
 0x2c9   : > { %v1710_v43 = vpop.f32.mrf.mxu1  ;;  %v1242_v52 = vld [vmem:[#allocation4 + $0x10] sm:$0xff] }
 0x2cd   : > { %v1243_v60 = vld [vmem:[#allocation4 + $0x18] sm:$0xff] }
 0x314   : > { %v1247_v46 = vpop.permute.xlu1 %1246 }
 0x315   : > { %v1264_v55 = vmul.f32 %v1247_v46, %v1240_v54 }
 0x318   : > { %v1252_v50 = vpop.permute.xlu0 %1251 }
 0x319   : > { %v1265_v61 = vmul.f32 %v1252_v50, %v1241_v58 }
 0x31c   : > { %v1257_v51 = vpop.permute.xlu1 %1256 }
 0x31d   : > { %v1266_v53 = vmul.f32 %v1257_v51, %v1242_v52 }
 0x31f   : > { %v1268_v62 = vcombine.low %v1264_v55, %v1266_v53  ;;  %v1269_v63 = vcombine.high %v1264_v55, %v1266_v53 }
 0x320   : > { %v1262_v59 = vpop.permute.xlu0 %1261 }
 0x321   : > { %v1267_v1 = vmul.f32 %v1262_v59, %v1243_v60  ;;  %v1276_v5 = vrot.slane %v1268_v62, %v1275_v56  ;;  %v1283_v6 = vrot.slane %v1269_v63, %v1275_v56 }
 0x323   : > { %v1284_v2 = vcombine.low %v1265_v61, %v1267_v1  ;;  %v1285_v3 = vcombine.high %v1265_v61, %v1267_v1 }
 0x325   : > { %v1292_v7 = vrot.slane %v1284_v2, %v1275_v56  ;;  %v1299_v8 = vrot.slane %v1285_v3, %v1275_v56 }
 0x327   : > { %v1300_v9 = vcombine.low %v1276_v5, %v1292_v7  ;;  %v1301_v10 = vcombine.high %v1276_v5, %v1292_v7  ;;  %v1316_v11 = vcombine.low %v1283_v6, %v1299_v8  ;;  %v1317_v12 = vcombine.high %v1283_v6, %v1299_v8 }
 0x329   : > { %v1308_v13 = vrot.slane %v1300_v9, %v1307_v4  ;;  %v1315_v14 = vrot.slane %v1301_v10, %v1307_v4  ;;  %v1324_v16 = vrot.slane %v1316_v11, %v1307_v4  ;;  %v1331_v17 = vrot.slane %v1317_v12, %v1307_v4 }
 0x32b   : > { %v1336_v18 = vcombine.low %v1308_v13, %v1315_v14  ;;  %v1639_v19 = vcombine.high %v1308_v13, %v1315_v14  ;;  %v1352_v20 = vcombine.low %v1324_v16, %v1331_v17  ;;  %v1640_v21 = vcombine.high %v1324_v16, %v1331_v17 }
 0x32d   : > { %v1343_v22 = vrot.slane %v1336_v18, %v1275_v56  ;;  %v1351_v23 = vrot.slane %v1639_v19, %v1275_v56  ;;  %v1359_v24 = vrot.slane %v1352_v20, %v1275_v56  ;;  %v1367_v15 = vrot.slane %v1640_v21, %v1275_v56 }
 0x32f   : > { %v1369_v25 = vcombine.high %v1343_v22, %v1351_v23  ;;  %v1385_v26 = vcombine.high %v1359_v24, %v1367_v15  ;;  %v1368_v27 = vcombine.low %v1343_v22, %v1351_v23  ;;  %v1384_v28 = vcombine.low %v1359_v24, %v1367_v15 }
 0x331   : > { %v1383_v29 = vrot.slane %v1369_v25, %v1307_v4  ;;  %v1399_v0 = vrot.slane %v1385_v26, %v1307_v4  ;;  %v1376_v30 = vrot.slane %v1368_v27, %v1307_v4  ;;  %v1392_v31 = vrot.slane %v1384_v28, %v1307_v4 }
 0x333   : > { %v1402_v32 = vcombine.low %v1383_v29, %v1399_v0  ;;  %v1401_v33 = vcombine.high %v1376_v30, %v1392_v31  ;;  %v1400_v34 = vcombine.low %v1376_v30, %v1392_v31  ;;  %v1403_v35 = vcombine.high %v1383_v29, %v1399_v0 }
 0x335   : > { %1409 = vrot.lane.b32.xlu0 %v1402_v32, %s1808_s7  ;;  %1405 = vrot.lane.b32.xlu1 %v1401_v33, %s1809_s8 }
 0x339   : > { %1413 = vrot.lane.b32.xlu1 %v1403_v35, %s1810_s9 }
 0x3a7   : > { %v1406_v36 = vpop.permute.xlu1 %1405  ;;  %v1410_v37 = vpop.permute.xlu0 %1409 }
 0x3a8   : > { %v1417_v38 = vsel %vm359_vm0, %v1400_v34, %v1406_v36 }
 0x3a9   : > { %v1419_v40 = vsel %vm1418_vm5, %v1417_v38, %v1410_v37 }
 0x3ab   : > { %v1414_v39 = vpop.permute.xlu1 %1413 }
 0x3ac   : > { %v1421_v41 = vsel %vm1420_vm6, %v1419_v40, %v1414_v39 }
 0x3ad   : > { %v1422_v42 = vpack.c.bf16 %v1421_v41, %v1421_v41 }
 0x3af   : > { %1424 = vst.msk [vmem:[%s336_s13] sm:$0xf] %vm1423_vm7, %v1422_v42 }
 0x3b0 PF: > { %s15_s17 = sadd.s32 1, %s1800_s17   ;;  %s2045_s15 = smov %s1796_s16 }
 0x3b1   : > { %p12_p5 = scmp.ge.s32.totalorder %s15_s17, 4   ;;  %s2046_s16 = smov %s2048_s18 }
 0x3b3   :  { %14 = sbr.rel (!%p12_p5) target bundleno = 2 (0x2), region = 100 }

</bundles_post_ra>
